<compile_context>
chip_gen: v6e
topology: v6e:2x2x1
jax: 0.10.0
libtpu: 0.0.40
codegen_flags: <defaults>
</compile_context>

<pallas_src>
import functools

import jax
import jax.numpy as jnp
import numpy as np
from jax import lax
from jax.experimental import pallas as pl
from jax.experimental.pallas import tpu as pltpu


_TILE_M = 512                  # output-pixel rows per grid step (v7x-safe VMEM)
_COMPUTE_DTYPE = jnp.bfloat16  # MXU operand dtype; accumulation stays f32

_PARALLEL = pltpu.CompilerParams(dimension_semantics=("parallel",))


def _round_up(x, m):
    return (x + m - 1) // m * m


def _choose_tile(m):
    """Row tile (multiple of 8) and padded row count for an M-row matrix."""
    tm = _TILE_M if m >= _TILE_M else _round_up(m, 8)
    return tm, _round_up(m, tm)


# ----------------------------- Pallas kernels ------------------------------

def _conv_taps_kernel(t_ref, w_ref, b_ref, o_ref, *, n_taps, relu):
    """3x3 conv as a sum of per-tap matmuls (f32 accumulator on the MXU).

    t_ref: (n_taps, tm, C_in)  bf16 shifted-window slabs
    w_ref: (n_taps, C_in, C_out) bf16
    b_ref: (1, C_out) f32
    o_ref: (tm, C_out) bf16
    """
    acc = jnp.dot(t_ref[0], w_ref[0], preferred_element_type=jnp.float32)
    for k in range(1, n_taps):
        acc = acc + jnp.dot(t_ref[k], w_ref[k],
                            preferred_element_type=jnp.float32)
    acc = acc + b_ref[...]
    if relu:
        acc = jnp.maximum(acc, 0.0)
    o_ref[...] = acc.astype(o_ref.dtype)


def _maxpool_kernel(t_ref, o_ref, *, n_taps):
    # t_ref: (n_taps, tm, C) shifted window slabs -> elementwise max over taps.
    acc = t_ref[0]
    for k in range(1, n_taps):
        acc = jnp.maximum(acc, t_ref[k])
    o_ref[...] = acc


def _fused_1x1_kernel(x_ref, w4_ref, b4_ref, w5_ref, b5_ref, o_ref):
    """Fused Conv1x1(32->32)+ReLU then Conv1x1(32->2): one HBM pass."""
    h = jnp.dot(x_ref[...], w4_ref[...], preferred_element_type=jnp.float32)
    h = jnp.maximum(h + b4_ref[...], 0.0).astype(x_ref.dtype)
    y = jnp.dot(h, w5_ref[...], preferred_element_type=jnp.float32)
    o_ref[...] = (y + b5_ref[...]).astype(o_ref.dtype)


# ------------------------------- wrappers -----------------------------------

def _extract_taps(x_nhwc, ksize, stride, pad, pad_value):
    """k*k shifted slabs of the padded input, each (N, H_out, W_out, C)."""
    N, H, W, C = x_nhwc.shape
    H_out = (H + 2 * pad - ksize) // stride + 1
    W_out = (W + 2 * pad - ksize) // stride + 1
    xp = jnp.pad(x_nhwc, ((0, 0), (pad, pad), (pad, pad), (0, 0)),
                 constant_values=pad_value)
    slabs = []
    for kh in range(ksize):
        for kw in range(ksize):
            sl = xp[:, kh::stride, kw::stride, :][:, :H_out, :W_out, :]
            slabs.append(sl)
    return slabs, (N, H_out, W_out, C)


def _stack_rows(slabs, M, C, M_pad, dtype):
    taps = jnp.stack([s.reshape(M, C) for s in slabs], axis=0).astype(dtype)
    if M_pad != M:
        taps = jnp.pad(taps, ((0, 0), (0, M_pad - M), (0, 0)))
    return taps


def conv3x3(x_nhwc, w_oihw, b, *, stride, relu):
    C_out, C_in, KH, KW = w_oihw.shape
    n_taps = KH * KW
    slabs, (N, H_out, W_out, _) = _extract_taps(x_nhwc, KH, stride, 1, 0.0)
    M = N * H_out * W_out
    tm, M_pad = _choose_tile(M)
    taps = _stack_rows(slabs, M, C_in, M_pad, _COMPUTE_DTYPE)
    # (O, I, KH, KW) -> (KH*KW, I, O); tap order matches _extract_taps loop.
    w = jnp.transpose(w_oihw, (2, 3, 1, 0)).reshape(n_taps, C_in, C_out)
    w = w.astype(_COMPUTE_DTYPE)
    b2 = b.reshape(1, C_out).astype(jnp.float32)

    cost = pl.CostEstimate(
        flops=2 * M_pad * n_taps * C_in * C_out,
        transcendentals=0,
        bytes_accessed=(taps.size + w.size) * 2 + b2.size * 4
                       + M_pad * C_out * 2)

    out = pl.pallas_call(
        functools.partial(_conv_taps_kernel, n_taps=n_taps, relu=relu),
        out_shape=jax.ShapeDtypeStruct((M_pad, C_out), _COMPUTE_DTYPE),
        grid=(M_pad // tm,),
        in_specs=[
            pl.BlockSpec((n_taps, tm, C_in), lambda i: (0, i, 0)),
            pl.BlockSpec((n_taps, C_in, C_out), lambda i: (0, 0, 0)),
            pl.BlockSpec((1, C_out), lambda i: (0, 0)),
        ],
        out_specs=pl.BlockSpec((tm, C_out), lambda i: (i, 0)),
        compiler_params=_PARALLEL,
        cost_estimate=cost,
    )(taps, w, b2)
    return out[:M].reshape(N, H_out, W_out, C_out)


def maxpool3x3(x_nhwc, *, stride=2, pad=1):
    # PyTorch MaxPool2d uses implicit -inf padding; max commutes with the
    # (monotone) bf16 rounding, so pooling in bf16 is exact.
    slabs, (N, H_out, W_out, C) = _extract_taps(x_nhwc, 3, stride, pad,
                                                -jnp.inf)
    M = N * H_out * W_out
    tm, M_pad = _choose_tile(M)
    taps = _stack_rows(slabs, M, C, M_pad, x_nhwc.dtype)
    out = pl.pallas_call(
        functools.partial(_maxpool_kernel, n_taps=9),
        out_shape=jax.ShapeDtypeStruct((M_pad, C), x_nhwc.dtype),
        grid=(M_pad // tm,),
        in_specs=[pl.BlockSpec((9, tm, C), lambda i: (0, i, 0))],
        out_specs=pl.BlockSpec((tm, C), lambda i: (i, 0)),
        compiler_params=_PARALLEL,
    )(taps)
    return out[:M].reshape(N, H_out, W_out, C)


def fused_conv1x1_pair(x_nhwc, w4, b4, w5, b5):
    N, H, W, C_in = x_nhwc.shape
    C_mid = w4.shape[0]
    C_out = w5.shape[0]
    M = N * H * W
    tm, M_pad = _choose_tile(M)
    x = x_nhwc.reshape(M, C_in).astype(_COMPUTE_DTYPE)
    if M_pad != M:
        x = jnp.pad(x, ((0, M_pad - M), (0, 0)))
    w4m = w4.reshape(C_mid, C_in).T.astype(_COMPUTE_DTYPE)    # (C_in, C_mid)
    w5m = w5.reshape(C_out, C_mid).T.astype(_COMPUTE_DTYPE)   # (C_mid, C_out)
    b4m = b4.reshape(1, C_mid).astype(jnp.float32)
    b5m = b5.reshape(1, C_out).astype(jnp.float32)

    cost = pl.CostEstimate(
        flops=2 * M_pad * C_in * C_mid + 2 * M_pad * C_mid * C_out,
        transcendentals=0,
        bytes_accessed=(x.size + w4m.size + w5m.size) * 2
                       + (b4m.size + b5m.size) * 4 + M_pad * C_out * 4)

    out = pl.pallas_call(
        _fused_1x1_kernel,
        out_shape=jax.ShapeDtypeStruct((M_pad, C_out), jnp.float32),
        grid=(M_pad // tm,),
        in_specs=[
            pl.BlockSpec((tm, C_in), lambda i: (i, 0)),
            pl.BlockSpec((C_in, C_mid), lambda i: (0, 0)),
            pl.BlockSpec((1, C_mid), lambda i: (0, 0)),
            pl.BlockSpec((C_mid, C_out), lambda i: (0, 0)),
            pl.BlockSpec((1, C_out), lambda i: (0, 0)),
        ],
        out_specs=pl.BlockSpec((tm, C_out), lambda i: (i, 0)),
        compiler_params=_PARALLEL,
        cost_estimate=cost,
    )(x, w4m, b4m, w5m, b5m)
    return out[:M].reshape(N, H, W, C_out)


def discriminator_forward(x_nchw, params):
    (w1, b1), (w2, b2), (w3, b3), (w4, b4), (w5, b5) = params
    x = jnp.transpose(x_nchw, (0, 2, 3, 1))              # NCHW -> NHWC
    x = conv3x3(x, w1, b1, stride=2, relu=True)          # Conv(3,2,1) + ReLU
    x = conv3x3(x, w2, b2, stride=2, relu=True)          # Conv(3,2,1) + ReLU
    x = maxpool3x3(x)                                    # MaxPool(3,2,1)
    x = conv3x3(x, w3, b3, stride=1, relu=True)          # Conv(3,1,1) + ReLU
    x = fused_conv1x1_pair(x, w4, b4, w5, b5)            # Conv1x1+ReLU+Conv1x1
    x = jnp.transpose(x, (0, 3, 1, 2))                   # back to NCHW (f32)
    return x.reshape(x.shape[0], -1, 2)                  # (N, C*H*W/2, 2)


# ------------------------- deterministic parameters -------------------------

def init_params(key, input_features):
    specs = [(96, input_features, 3, 3),
             (64, 96, 3, 3),
             (32, 64, 3, 3),
             (32, 32, 1, 1),
             (2, 32, 1, 1)]
    params = []
    for co, ci, kh, kw in specs:
        key, kkw, kkb = jax.random.split(key, 3)
        fan_in = ci * kh * kw
        bound = (1.0 / fan_in) ** 0.5
        w = jax.random.uniform(kkw, (co, ci, kh, kw), jnp.float32, -bound, bound)
        b = jax.random.uniform(kkb, (co,), jnp.float32, -bound, bound)
        params.append((w, b))
    return params


# ------------------------------ pure-JAX ref --------------------------------

def _ref_forward(x_nchw, params):
    x = jnp.transpose(x_nchw, (0, 2, 3, 1))

    def conv(x, w, b, stride, pad, relu):
        wt = jnp.transpose(w, (2, 3, 1, 0))  # OIHW -> HWIO
        y = lax.conv_general_dilated(
            x, wt, (stride, stride), [(pad, pad), (pad, pad)],
            dimension_numbers=("NHWC", "HWIO", "NHWC"))
        y = y + b
        return jnp.maximum(y, 0.0) if relu else y

    (w1, b1), (w2, b2), (w3, b3), (w4, b4), (w5, b5) = params
    x = conv(x, w1, b1, 2, 1, True)
    x = conv(x, w2, b2, 2, 1, True)
    x = lax.reduce_window(x, -jnp.inf, lax.max, (1, 3, 3, 1), (1, 2, 2, 1),
                          [(0, 0), (1, 1), (1, 1), (0, 0)])
    x = conv(x, w3, b3, 1, 1, True)
    x = conv(x, w4, b4, 1, 0, True)
    x = conv(x, w5, b5, 1, 0, False)
    x = jnp.transpose(x, (0, 3, 1, 2))
    return x.reshape(x.shape[0], -1, 2)


if __name__ == "__main__":
    key = jax.random.PRNGKey(0)
    k_x, k_p = jax.random.split(key)

    input_features = 4
    x = jax.random.normal(k_x, (2, input_features, 16, 16), jnp.float32)
    params = init_params(k_p, input_features)

    out = jax.jit(discriminator_forward)(x, params)
    out = jax.block_until_ready(out)

    # 16x16 -> 8x8 -> 4x4 -> pool 2x2 -> 2x2 ; final convs C=2 => (2, 4, 2)
    assert out.shape == (2, 4, 2), out.shape

    ref = _ref_forward(x, params)
    # bf16 operands / f32 accumulation vs the f32 reference.
    np.testing.assert_allclose(np.asarray(out), np.asarray(ref),
                               rtol=2e-2, atol=2e-2)
    print("KERNEL_OK")
</pallas_src>

<mosaic_0001>
module attributes {stable_mosaic.version = 11 : i64} {
  func.func @_conv_taps_kernel(%arg0: i32, %arg1: memref<9x128x4xbf16, #tpu.memory_space<vmem>>, %arg2: memref<9x4x96xbf16, #tpu.memory_space<vmem>>, %arg3: memref<1x96xf32, #tpu.memory_space<vmem>>, %arg4: memref<128x96xbf16, #tpu.memory_space<vmem>>) attributes {dimension_semantics = [#tpu.dimension_semantics<parallel>], iteration_bounds = array<i64: 1>, scalar_prefetch = 0 : i64, scratch_operands = 0 : i64, tpu.core_type = #tpu.core_type<tc>, window_params = [{transform_indices = @transform_0, window_bounds = array<i64: 9, 128, 4>}, {pipeline_mode = #tpu.pipeline_mode<synchronous>, transform_indices = @transform_1, window_bounds = array<i64: 9, 4, 96>}, {pipeline_mode = #tpu.pipeline_mode<synchronous>, transform_indices = @transform_2, window_bounds = array<i64: 1, 96>}, {transform_indices = @transform_3, window_bounds = array<i64: 128, 96>}]} {
    %c0 = arith.constant 0 : index
    %c0_0 = arith.constant 0 : index
    %c0_1 = arith.constant 0 : index
    %0 = vector.load %arg1[%c0, %c0_0, %c0_1] : memref<9x128x4xbf16, #tpu.memory_space<vmem>>, vector<1x128x4xbf16>
    %1 = vector.shape_cast %0 : vector<1x128x4xbf16> to vector<128x4xbf16>
    %c0_2 = arith.constant 0 : index
    %c0_3 = arith.constant 0 : index
    %c0_4 = arith.constant 0 : index
    %2 = vector.load %arg2[%c0_2, %c0_3, %c0_4] : memref<9x4x96xbf16, #tpu.memory_space<vmem>>, vector<1x4x96xbf16>
    %3 = vector.shape_cast %2 : vector<1x4x96xbf16> to vector<4x96xbf16>
    %cst = arith.constant dense<0.000000e+00> : vector<128x96xf32>
    %4 = tpu.matmul %1, %3, %cst {dimension_numbers = #tpu.dot_dimension_numbers<[1], [0], [0], [1], [0, 0, 1, 1], [], []>} : vector<128x4xbf16>, vector<4x96xbf16>, vector<128x96xf32> -> vector<128x96xf32>
    %c1 = arith.constant 1 : index
    %c0_5 = arith.constant 0 : index
    %c0_6 = arith.constant 0 : index
    %5 = vector.load %arg1[%c1, %c0_5, %c0_6] : memref<9x128x4xbf16, #tpu.memory_space<vmem>>, vector<1x128x4xbf16>
    %6 = vector.shape_cast %5 : vector<1x128x4xbf16> to vector<128x4xbf16>
    %c1_7 = arith.constant 1 : index
    %c0_8 = arith.constant 0 : index
    %c0_9 = arith.constant 0 : index
    %7 = vector.load %arg2[%c1_7, %c0_8, %c0_9] : memref<9x4x96xbf16, #tpu.memory_space<vmem>>, vector<1x4x96xbf16>
    %8 = vector.shape_cast %7 : vector<1x4x96xbf16> to vector<4x96xbf16>
    %cst_10 = arith.constant dense<0.000000e+00> : vector<128x96xf32>
    %9 = tpu.matmul %6, %8, %cst_10 {dimension_numbers = #tpu.dot_dimension_numbers<[1], [0], [0], [1], [0, 0, 1, 1], [], []>} : vector<128x4xbf16>, vector<4x96xbf16>, vector<128x96xf32> -> vector<128x96xf32>
    %10 = arith.addf %4, %9 : vector<128x96xf32>
    %c2 = arith.constant 2 : index
    %c0_11 = arith.constant 0 : index
    %c0_12 = arith.constant 0 : index
    %11 = vector.load %arg1[%c2, %c0_11, %c0_12] : memref<9x128x4xbf16, #tpu.memory_space<vmem>>, vector<1x128x4xbf16>
    %12 = vector.shape_cast %11 : vector<1x128x4xbf16> to vector<128x4xbf16>
    %c2_13 = arith.constant 2 : index
    %c0_14 = arith.constant 0 : index
    %c0_15 = arith.constant 0 : index
    %13 = vector.load %arg2[%c2_13, %c0_14, %c0_15] : memref<9x4x96xbf16, #tpu.memory_space<vmem>>, vector<1x4x96xbf16>
    %14 = vector.shape_cast %13 : vector<1x4x96xbf16> to vector<4x96xbf16>
    %cst_16 = arith.constant dense<0.000000e+00> : vector<128x96xf32>
    %15 = tpu.matmul %12, %14, %cst_16 {dimension_numbers = #tpu.dot_dimension_numbers<[1], [0], [0], [1], [0, 0, 1, 1], [], []>} : vector<128x4xbf16>, vector<4x96xbf16>, vector<128x96xf32> -> vector<128x96xf32>
    %16 = arith.addf %10, %15 : vector<128x96xf32>
    %c3 = arith.constant 3 : index
    %c0_17 = arith.constant 0 : index
    %c0_18 = arith.constant 0 : index
    %17 = vector.load %arg1[%c3, %c0_17, %c0_18] : memref<9x128x4xbf16, #tpu.memory_space<vmem>>, vector<1x128x4xbf16>
    %18 = vector.shape_cast %17 : vector<1x128x4xbf16> to vector<128x4xbf16>
    %c3_19 = arith.constant 3 : index
    %c0_20 = arith.constant 0 : index
    %c0_21 = arith.constant 0 : index
    %19 = vector.load %arg2[%c3_19, %c0_20, %c0_21] : memref<9x4x96xbf16, #tpu.memory_space<vmem>>, vector<1x4x96xbf16>
    %20 = vector.shape_cast %19 : vector<1x4x96xbf16> to vector<4x96xbf16>
    %cst_22 = arith.constant dense<0.000000e+00> : vector<128x96xf32>
    %21 = tpu.matmul %18, %20, %cst_22 {dimension_numbers = #tpu.dot_dimension_numbers<[1], [0], [0], [1], [0, 0, 1, 1], [], []>} : vector<128x4xbf16>, vector<4x96xbf16>, vector<128x96xf32> -> vector<128x96xf32>
    %22 = arith.addf %16, %21 : vector<128x96xf32>
    %c4 = arith.constant 4 : index
    %c0_23 = arith.constant 0 : index
    %c0_24 = arith.constant 0 : index
    %23 = vector.load %arg1[%c4, %c0_23, %c0_24] : memref<9x128x4xbf16, #tpu.memory_space<vmem>>, vector<1x128x4xbf16>
    %24 = vector.shape_cast %23 : vector<1x128x4xbf16> to vector<128x4xbf16>
    %c4_25 = arith.constant 4 : index
    %c0_26 = arith.constant 0 : index
    %c0_27 = arith.constant 0 : index
    %25 = vector.load %arg2[%c4_25, %c0_26, %c0_27] : memref<9x4x96xbf16, #tpu.memory_space<vmem>>, vector<1x4x96xbf16>
    %26 = vector.shape_cast %25 : vector<1x4x96xbf16> to vector<4x96xbf16>
    %cst_28 = arith.constant dense<0.000000e+00> : vector<128x96xf32>
    %27 = tpu.matmul %24, %26, %cst_28 {dimension_numbers = #tpu.dot_dimension_numbers<[1], [0], [0], [1], [0, 0, 1, 1], [], []>} : vector<128x4xbf16>, vector<4x96xbf16>, vector<128x96xf32> -> vector<128x96xf32>
    %28 = arith.addf %22, %27 : vector<128x96xf32>
    %c5 = arith.constant 5 : index
    %c0_29 = arith.constant 0 : index
    %c0_30 = arith.constant 0 : index
    %29 = vector.load %arg1[%c5, %c0_29, %c0_30] : memref<9x128x4xbf16, #tpu.memory_space<vmem>>, vector<1x128x4xbf16>
    %30 = vector.shape_cast %29 : vector<1x128x4xbf16> to vector<128x4xbf16>
    %c5_31 = arith.constant 5 : index
    %c0_32 = arith.constant 0 : index
    %c0_33 = arith.constant 0 : index
    %31 = vector.load %arg2[%c5_31, %c0_32, %c0_33] : memref<9x4x96xbf16, #tpu.memory_space<vmem>>, vector<1x4x96xbf16>
    %32 = vector.shape_cast %31 : vector<1x4x96xbf16> to vector<4x96xbf16>
    %cst_34 = arith.constant dense<0.000000e+00> : vector<128x96xf32>
    %33 = tpu.matmul %30, %32, %cst_34 {dimension_numbers = #tpu.dot_dimension_numbers<[1], [0], [0], [1], [0, 0, 1, 1], [], []>} : vector<128x4xbf16>, vector<4x96xbf16>, vector<128x96xf32> -> vector<128x96xf32>
    %34 = arith.addf %28, %33 : vector<128x96xf32>
    %c6 = arith.constant 6 : index
    %c0_35 = arith.constant 0 : index
    %c0_36 = arith.constant 0 : index
    %35 = vector.load %arg1[%c6, %c0_35, %c0_36] : memref<9x128x4xbf16, #tpu.memory_space<vmem>>, vector<1x128x4xbf16>
    %36 = vector.shape_cast %35 : vector<1x128x4xbf16> to vector<128x4xbf16>
    %c6_37 = arith.constant 6 : index
    %c0_38 = arith.constant 0 : index
    %c0_39 = arith.constant 0 : index
    %37 = vector.load %arg2[%c6_37, %c0_38, %c0_39] : memref<9x4x96xbf16, #tpu.memory_space<vmem>>, vector<1x4x96xbf16>
    %38 = vector.shape_cast %37 : vector<1x4x96xbf16> to vector<4x96xbf16>
    %cst_40 = arith.constant dense<0.000000e+00> : vector<128x96xf32>
    %39 = tpu.matmul %36, %38, %cst_40 {dimension_numbers = #tpu.dot_dimension_numbers<[1], [0], [0], [1], [0, 0, 1, 1], [], []>} : vector<128x4xbf16>, vector<4x96xbf16>, vector<128x96xf32> -> vector<128x96xf32>
    %40 = arith.addf %34, %39 : vector<128x96xf32>
    %c7 = arith.constant 7 : index
    %c0_41 = arith.constant 0 : index
    %c0_42 = arith.constant 0 : index
    %41 = vector.load %arg1[%c7, %c0_41, %c0_42] : memref<9x128x4xbf16, #tpu.memory_space<vmem>>, vector<1x128x4xbf16>
    %42 = vector.shape_cast %41 : vector<1x128x4xbf16> to vector<128x4xbf16>
    %c7_43 = arith.constant 7 : index
    %c0_44 = arith.constant 0 : index
    %c0_45 = arith.constant 0 : index
    %43 = vector.load %arg2[%c7_43, %c0_44, %c0_45] : memref<9x4x96xbf16, #tpu.memory_space<vmem>>, vector<1x4x96xbf16>
    %44 = vector.shape_cast %43 : vector<1x4x96xbf16> to vector<4x96xbf16>
    %cst_46 = arith.constant dense<0.000000e+00> : vector<128x96xf32>
    %45 = tpu.matmul %42, %44, %cst_46 {dimension_numbers = #tpu.dot_dimension_numbers<[1], [0], [0], [1], [0, 0, 1, 1], [], []>} : vector<128x4xbf16>, vector<4x96xbf16>, vector<128x96xf32> -> vector<128x96xf32>
    %46 = arith.addf %40, %45 : vector<128x96xf32>
    %c8 = arith.constant 8 : index
    %c0_47 = arith.constant 0 : index
    %c0_48 = arith.constant 0 : index
    %47 = vector.load %arg1[%c8, %c0_47, %c0_48] : memref<9x128x4xbf16, #tpu.memory_space<vmem>>, vector<1x128x4xbf16>
    %48 = vector.shape_cast %47 : vector<1x128x4xbf16> to vector<128x4xbf16>
    %c8_49 = arith.constant 8 : index
    %c0_50 = arith.constant 0 : index
    %c0_51 = arith.constant 0 : index
    %49 = vector.load %arg2[%c8_49, %c0_50, %c0_51] : memref<9x4x96xbf16, #tpu.memory_space<vmem>>, vector<1x4x96xbf16>
    %50 = vector.shape_cast %49 : vector<1x4x96xbf16> to vector<4x96xbf16>
    %cst_52 = arith.constant dense<0.000000e+00> : vector<128x96xf32>
    %51 = tpu.matmul %48, %50, %cst_52 {dimension_numbers = #tpu.dot_dimension_numbers<[1], [0], [0], [1], [0, 0, 1, 1], [], []>} : vector<128x4xbf16>, vector<4x96xbf16>, vector<128x96xf32> -> vector<128x96xf32>
    %52 = arith.addf %46, %51 : vector<128x96xf32>
    %c0_53 = arith.constant 0 : index
    %c0_54 = arith.constant 0 : index
    %53 = vector.load %arg3[%c0_53, %c0_54] : memref<1x96xf32, #tpu.memory_space<vmem>>, vector<1x96xf32>
    %54 = vector.broadcast %53 : vector<1x96xf32> to vector<128x96xf32>
    %55 = arith.addf %52, %54 : vector<128x96xf32>
    %cst_55 = arith.constant 0.000000e+00 : f32
    %56 = vector.broadcast %cst_55 : f32 to vector<128x96xf32>
    %57 = arith.maximumf %55, %56 : vector<128x96xf32>
    %58 = arith.truncf %57 : vector<128x96xf32> to vector<128x96xbf16>
    %c0_56 = arith.constant 0 : index
    %c0_57 = arith.constant 0 : index
    %59 = vector.load %arg4[%c0_56, %c0_57] : memref<128x96xbf16, #tpu.memory_space<vmem>>, vector<128x96xbf16>
    tpu.vector_store %arg4[%c0_56, %c0_57], %58 {strides = array<i32>} : memref<128x96xbf16, #tpu.memory_space<vmem>>, vector<128x96xbf16>,
    return
  }
  func.func @transform_0(%arg0: i32) -> (i32, i32, i32) {
    %c0_i32 = arith.constant 0 : i32
    %c0_i32_0 = arith.constant 0 : i32
    %c0_i32_1 = arith.constant 0 : i32
    return %c0_i32, %arg0, %c0_i32_0 : i32, i32, i32
  }
  func.func @transform_1(%arg0: i32) -> (i32, i32, i32) {
    %c0_i32 = arith.constant 0 : i32
    %c0_i32_0 = arith.constant 0 : i32
    %c0_i32_1 = arith.constant 0 : i32
    %c0_i32_2 = arith.constant 0 : i32
    return %c0_i32, %c0_i32_0, %c0_i32_1 : i32, i32, i32
  }
  func.func @transform_2(%arg0: i32) -> (i32, i32) {
    %c0_i32 = arith.constant 0 : i32
    %c0_i32_0 = arith.constant 0 : i32
    %c0_i32_1 = arith.constant 0 : i32
    return %c0_i32, %c0_i32_0 : i32, i32
  }
  func.func @transform_3(%arg0: i32) -> (i32, i32) {
    %c0_i32 = arith.constant 0 : i32
    %c0_i32_0 = arith.constant 0 : i32
    return %arg0, %c0_i32 : i32, i32
  }
}

module attributes {stable_mosaic.version = 11 : i64} {
  func.func @_conv_taps_kernel(%arg0: i32, %arg1: memref<9x32x96xbf16, #tpu.memory_space<vmem>>, %arg2: memref<9x96x64xbf16, #tpu.memory_space<vmem>>, %arg3: memref<1x64xf32, #tpu.memory_space<vmem>>, %arg4: memref<32x64xbf16, #tpu.memory_space<vmem>>) attributes {dimension_semantics = [#tpu.dimension_semantics<parallel>], iteration_bounds = array<i64: 1>, scalar_prefetch = 0 : i64, scratch_operands = 0 : i64, tpu.core_type = #tpu.core_type<tc>, window_params = [{transform_indices = @transform_0, window_bounds = array<i64: 9, 32, 96>}, {pipeline_mode = #tpu.pipeline_mode<synchronous>, transform_indices = @transform_1, window_bounds = array<i64: 9, 96, 64>}, {pipeline_mode = #tpu.pipeline_mode<synchronous>, transform_indices = @transform_2, window_bounds = array<i64: 1, 64>}, {transform_indices = @transform_3, window_bounds = array<i64: 32, 64>}]} {
    %c0 = arith.constant 0 : index
    %c0_0 = arith.constant 0 : index
    %c0_1 = arith.constant 0 : index
    %0 = vector.load %arg1[%c0, %c0_0, %c0_1] : memref<9x32x96xbf16, #tpu.memory_space<vmem>>, vector<1x32x96xbf16>
    %1 = vector.shape_cast %0 : vector<1x32x96xbf16> to vector<32x96xbf16>
    %c0_2 = arith.constant 0 : index
    %c0_3 = arith.constant 0 : index
    %c0_4 = arith.constant 0 : index
    %2 = vector.load %arg2[%c0_2, %c0_3, %c0_4] : memref<9x96x64xbf16, #tpu.memory_space<vmem>>, vector<1x96x64xbf16>
    %3 = vector.shape_cast %2 : vector<1x96x64xbf16> to vector<96x64xbf16>
    %cst = arith.constant dense<0.000000e+00> : vector<32x64xf32>
    %4 = tpu.matmul %1, %3, %cst {dimension_numbers = #tpu.dot_dimension_numbers<[1], [0], [0], [1], [0, 0, 1, 1], [], []>} : vector<32x96xbf16>, vector<96x64xbf16>, vector<32x64xf32> -> vector<32x64xf32>
    %c1 = arith.constant 1 : index
    %c0_5 = arith.constant 0 : index
    %c0_6 = arith.constant 0 : index
    %5 = vector.load %arg1[%c1, %c0_5, %c0_6] : memref<9x32x96xbf16, #tpu.memory_space<vmem>>, vector<1x32x96xbf16>
    %6 = vector.shape_cast %5 : vector<1x32x96xbf16> to vector<32x96xbf16>
    %c1_7 = arith.constant 1 : index
    %c0_8 = arith.constant 0 : index
    %c0_9 = arith.constant 0 : index
    %7 = vector.load %arg2[%c1_7, %c0_8, %c0_9] : memref<9x96x64xbf16, #tpu.memory_space<vmem>>, vector<1x96x64xbf16>
    %8 = vector.shape_cast %7 : vector<1x96x64xbf16> to vector<96x64xbf16>
    %cst_10 = arith.constant dense<0.000000e+00> : vector<32x64xf32>
    %9 = tpu.matmul %6, %8, %cst_10 {dimension_numbers = #tpu.dot_dimension_numbers<[1], [0], [0], [1], [0, 0, 1, 1], [], []>} : vector<32x96xbf16>, vector<96x64xbf16>, vector<32x64xf32> -> vector<32x64xf32>
    %10 = arith.addf %4, %9 : vector<32x64xf32>
    %c2 = arith.constant 2 : index
    %c0_11 = arith.constant 0 : index
    %c0_12 = arith.constant 0 : index
    %11 = vector.load %arg1[%c2, %c0_11, %c0_12] : memref<9x32x96xbf16, #tpu.memory_space<vmem>>, vector<1x32x96xbf16>
    %12 = vector.shape_cast %11 : vector<1x32x96xbf16> to vector<32x96xbf16>
    %c2_13 = arith.constant 2 : index
    %c0_14 = arith.constant 0 : index
    %c0_15 = arith.constant 0 : index
    %13 = vector.load %arg2[%c2_13, %c0_14, %c0_15] : memref<9x96x64xbf16, #tpu.memory_space<vmem>>, vector<1x96x64xbf16>
    %14 = vector.shape_cast %13 : vector<1x96x64xbf16> to vector<96x64xbf16>
    %cst_16 = arith.constant dense<0.000000e+00> : vector<32x64xf32>
    %15 = tpu.matmul %12, %14, %cst_16 {dimension_numbers = #tpu.dot_dimension_numbers<[1], [0], [0], [1], [0, 0, 1, 1], [], []>} : vector<32x96xbf16>, vector<96x64xbf16>, vector<32x64xf32> -> vector<32x64xf32>
    %16 = arith.addf %10, %15 : vector<32x64xf32>
    %c3 = arith.constant 3 : index
    %c0_17 = arith.constant 0 : index
    %c0_18 = arith.constant 0 : index
    %17 = vector.load %arg1[%c3, %c0_17, %c0_18] : memref<9x32x96xbf16, #tpu.memory_space<vmem>>, vector<1x32x96xbf16>
    %18 = vector.shape_cast %17 : vector<1x32x96xbf16> to vector<32x96xbf16>
    %c3_19 = arith.constant 3 : index
    %c0_20 = arith.constant 0 : index
    %c0_21 = arith.constant 0 : index
    %19 = vector.load %arg2[%c3_19, %c0_20, %c0_21] : memref<9x96x64xbf16, #tpu.memory_space<vmem>>, vector<1x96x64xbf16>
    %20 = vector.shape_cast %19 : vector<1x96x64xbf16> to vector<96x64xbf16>
    %cst_22 = arith.constant dense<0.000000e+00> : vector<32x64xf32>
    %21 = tpu.matmul %18, %20, %cst_22 {dimension_numbers = #tpu.dot_dimension_numbers<[1], [0], [0], [1], [0, 0, 1, 1], [], []>} : vector<32x96xbf16>, vector<96x64xbf16>, vector<32x64xf32> -> vector<32x64xf32>
    %22 = arith.addf %16, %21 : vector<32x64xf32>
    %c4 = arith.constant 4 : index
    %c0_23 = arith.constant 0 : index
    %c0_24 = arith.constant 0 : index
    %23 = vector.load %arg1[%c4, %c0_23, %c0_24] : memref<9x32x96xbf16, #tpu.memory_space<vmem>>, vector<1x32x96xbf16>
    %24 = vector.shape_cast %23 : vector<1x32x96xbf16> to vector<32x96xbf16>
    %c4_25 = arith.constant 4 : index
    %c0_26 = arith.constant 0 : index
    %c0_27 = arith.constant 0 : index
    %25 = vector.load %arg2[%c4_25, %c0_26, %c0_27] : memref<9x96x64xbf16, #tpu.memory_space<vmem>>, vector<1x96x64xbf16>
    %26 = vector.shape_cast %25 : vector<1x96x64xbf16> to vector<96x64xbf16>
    %cst_28 = arith.constant dense<0.000000e+00> : vector<32x64xf32>
    %27 = tpu.matmul %24, %26, %cst_28 {dimension_numbers = #tpu.dot_dimension_numbers<[1], [0], [0], [1], [0, 0, 1, 1], [], []>} : vector<32x96xbf16>, vector<96x64xbf16>, vector<32x64xf32> -> vector<32x64xf32>
    %28 = arith.addf %22, %27 : vector<32x64xf32>
    %c5 = arith.constant 5 : index
    %c0_29 = arith.constant 0 : index
    %c0_30 = arith.constant 0 : index
    %29 = vector.load %arg1[%c5, %c0_29, %c0_30] : memref<9x32x96xbf16, #tpu.memory_space<vmem>>, vector<1x32x96xbf16>
    %30 = vector.shape_cast %29 : vector<1x32x96xbf16> to vector<32x96xbf16>
    %c5_31 = arith.constant 5 : index
    %c0_32 = arith.constant 0 : index
    %c0_33 = arith.constant 0 : index
    %31 = vector.load %arg2[%c5_31, %c0_32, %c0_33] : memref<9x96x64xbf16, #tpu.memory_space<vmem>>, vector<1x96x64xbf16>
    %32 = vector.shape_cast %31 : vector<1x96x64xbf16> to vector<96x64xbf16>
    %cst_34 = arith.constant dense<0.000000e+00> : vector<32x64xf32>
    %33 = tpu.matmul %30, %32, %cst_34 {dimension_numbers = #tpu.dot_dimension_numbers<[1], [0], [0], [1], [0, 0, 1, 1], [], []>} : vector<32x96xbf16>, vector<96x64xbf16>, vector<32x64xf32> -> vector<32x64xf32>
    %34 = arith.addf %28, %33 : vector<32x64xf32>
    %c6 = arith.constant 6 : index
    %c0_35 = arith.constant 0 : index
    %c0_36 = arith.constant 0 : index
    %35 = vector.load %arg1[%c6, %c0_35, %c0_36] : memref<9x32x96xbf16, #tpu.memory_space<vmem>>, vector<1x32x96xbf16>
    %36 = vector.shape_cast %35 : vector<1x32x96xbf16> to vector<32x96xbf16>
    %c6_37 = arith.constant 6 : index
    %c0_38 = arith.constant 0 : index
    %c0_39 = arith.constant 0 : index
    %37 = vector.load %arg2[%c6_37, %c0_38, %c0_39] : memref<9x96x64xbf16, #tpu.memory_space<vmem>>, vector<1x96x64xbf16>
    %38 = vector.shape_cast %37 : vector<1x96x64xbf16> to vector<96x64xbf16>
    %cst_40 = arith.constant dense<0.000000e+00> : vector<32x64xf32>
    %39 = tpu.matmul %36, %38, %cst_40 {dimension_numbers = #tpu.dot_dimension_numbers<[1], [0], [0], [1], [0, 0, 1, 1], [], []>} : vector<32x96xbf16>, vector<96x64xbf16>, vector<32x64xf32> -> vector<32x64xf32>
    %40 = arith.addf %34, %39 : vector<32x64xf32>
    %c7 = arith.constant 7 : index
    %c0_41 = arith.constant 0 : index
    %c0_42 = arith.constant 0 : index
    %41 = vector.load %arg1[%c7, %c0_41, %c0_42] : memref<9x32x96xbf16, #tpu.memory_space<vmem>>, vector<1x32x96xbf16>
    %42 = vector.shape_cast %41 : vector<1x32x96xbf16> to vector<32x96xbf16>
    %c7_43 = arith.constant 7 : index
    %c0_44 = arith.constant 0 : index
    %c0_45 = arith.constant 0 : index
    %43 = vector.load %arg2[%c7_43, %c0_44, %c0_45] : memref<9x96x64xbf16, #tpu.memory_space<vmem>>, vector<1x96x64xbf16>
    %44 = vector.shape_cast %43 : vector<1x96x64xbf16> to vector<96x64xbf16>
    %cst_46 = arith.constant dense<0.000000e+00> : vector<32x64xf32>
    %45 = tpu.matmul %42, %44, %cst_46 {dimension_numbers = #tpu.dot_dimension_numbers<[1], [0], [0], [1], [0, 0, 1, 1], [], []>} : vector<32x96xbf16>, vector<96x64xbf16>, vector<32x64xf32> -> vector<32x64xf32>
    %46 = arith.addf %40, %45 : vector<32x64xf32>
    %c8 = arith.constant 8 : index
    %c0_47 = arith.constant 0 : index
    %c0_48 = arith.constant 0 : index
    %47 = vector.load %arg1[%c8, %c0_47, %c0_48] : memref<9x32x96xbf16, #tpu.memory_space<vmem>>, vector<1x32x96xbf16>
    %48 = vector.shape_cast %47 : vector<1x32x96xbf16> to vector<32x96xbf16>
    %c8_49 = arith.constant 8 : index
    %c0_50 = arith.constant 0 : index
    %c0_51 = arith.constant 0 : index
    %49 = vector.load %arg2[%c8_49, %c0_50, %c0_51] : memref<9x96x64xbf16, #tpu.memory_space<vmem>>, vector<1x96x64xbf16>
    %50 = vector.shape_cast %49 : vector<1x96x64xbf16> to vector<96x64xbf16>
    %cst_52 = arith.constant dense<0.000000e+00> : vector<32x64xf32>
    %51 = tpu.matmul %48, %50, %cst_52 {dimension_numbers = #tpu.dot_dimension_numbers<[1], [0], [0], [1], [0, 0, 1, 1], [], []>} : vector<32x96xbf16>, vector<96x64xbf16>, vector<32x64xf32> -> vector<32x64xf32>
    %52 = arith.addf %46, %51 : vector<32x64xf32>
    %c0_53 = arith.constant 0 : index
    %c0_54 = arith.constant 0 : index
    %53 = vector.load %arg3[%c0_53, %c0_54] : memref<1x64xf32, #tpu.memory_space<vmem>>, vector<1x64xf32>
    %54 = vector.broadcast %53 : vector<1x64xf32> to vector<32x64xf32>
    %55 = arith.addf %52, %54 : vector<32x64xf32>
    %cst_55 = arith.constant 0.000000e+00 : f32
    %56 = vector.broadcast %cst_55 : f32 to vector<32x64xf32>
    %57 = arith.maximumf %55, %56 : vector<32x64xf32>
    %58 = arith.truncf %57 : vector<32x64xf32> to vector<32x64xbf16>
    %c0_56 = arith.constant 0 : index
    %c0_57 = arith.constant 0 : index
    %59 = vector.load %arg4[%c0_56, %c0_57] : memref<32x64xbf16, #tpu.memory_space<vmem>>, vector<32x64xbf16>
    tpu.vector_store %arg4[%c0_56, %c0_57], %58 {strides = array<i32>} : memref<32x64xbf16, #tpu.memory_space<vmem>>, vector<32x64xbf16>,
    return
  }
  func.func @transform_0(%arg0: i32) -> (i32, i32, i32) {
    %c0_i32 = arith.constant 0 : i32
    %c0_i32_0 = arith.constant 0 : i32
    %c0_i32_1 = arith.constant 0 : i32
    return %c0_i32, %arg0, %c0_i32_0 : i32, i32, i32
  }
  func.func @transform_1(%arg0: i32) -> (i32, i32, i32) {
    %c0_i32 = arith.constant 0 : i32
    %c0_i32_0 = arith.constant 0 : i32
    %c0_i32_1 = arith.constant 0 : i32
    %c0_i32_2 = arith.constant 0 : i32
    return %c0_i32, %c0_i32_0, %c0_i32_1 : i32, i32, i32
  }
  func.func @transform_2(%arg0: i32) -> (i32, i32) {
    %c0_i32 = arith.constant 0 : i32
    %c0_i32_0 = arith.constant 0 : i32
    %c0_i32_1 = arith.constant 0 : i32
    return %c0_i32, %c0_i32_0 : i32, i32
  }
  func.func @transform_3(%arg0: i32) -> (i32, i32) {
    %c0_i32 = arith.constant 0 : i32
    %c0_i32_0 = arith.constant 0 : i32
    return %arg0, %c0_i32 : i32, i32
  }
}

module attributes {stable_mosaic.version = 11 : i64} {
  func.func @_conv_taps_kernel(%arg0: i32, %arg1: memref<9x8x64xbf16, #tpu.memory_space<vmem>>, %arg2: memref<9x64x32xbf16, #tpu.memory_space<vmem>>, %arg3: memref<1x32xf32, #tpu.memory_space<vmem>>, %arg4: memref<8x32xbf16, #tpu.memory_space<vmem>>) attributes {dimension_semantics = [#tpu.dimension_semantics<parallel>], iteration_bounds = array<i64: 1>, scalar_prefetch = 0 : i64, scratch_operands = 0 : i64, tpu.core_type = #tpu.core_type<tc>, window_params = [{transform_indices = @transform_0, window_bounds = array<i64: 9, 8, 64>}, {pipeline_mode = #tpu.pipeline_mode<synchronous>, transform_indices = @transform_1, window_bounds = array<i64: 9, 64, 32>}, {pipeline_mode = #tpu.pipeline_mode<synchronous>, transform_indices = @transform_2, window_bounds = array<i64: 1, 32>}, {transform_indices = @transform_3, window_bounds = array<i64: 8, 32>}]} {
    %c0 = arith.constant 0 : index
    %c0_0 = arith.constant 0 : index
    %c0_1 = arith.constant 0 : index
    %0 = vector.load %arg1[%c0, %c0_0, %c0_1] : memref<9x8x64xbf16, #tpu.memory_space<vmem>>, vector<1x8x64xbf16>
    %1 = vector.shape_cast %0 : vector<1x8x64xbf16> to vector<8x64xbf16>
    %c0_2 = arith.constant 0 : index
    %c0_3 = arith.constant 0 : index
    %c0_4 = arith.constant 0 : index
    %2 = vector.load %arg2[%c0_2, %c0_3, %c0_4] : memref<9x64x32xbf16, #tpu.memory_space<vmem>>, vector<1x64x32xbf16>
    %3 = vector.shape_cast %2 : vector<1x64x32xbf16> to vector<64x32xbf16>
    %cst = arith.constant dense<0.000000e+00> : vector<8x32xf32>
    %4 = tpu.matmul %1, %3, %cst {dimension_numbers = #tpu.dot_dimension_numbers<[1], [0], [0], [1], [0, 0, 1, 1], [], []>} : vector<8x64xbf16>, vector<64x32xbf16>, vector<8x32xf32> -> vector<8x32xf32>
    %c1 = arith.constant 1 : index
    %c0_5 = arith.constant 0 : index
    %c0_6 = arith.constant 0 : index
    %5 = vector.load %arg1[%c1, %c0_5, %c0_6] : memref<9x8x64xbf16, #tpu.memory_space<vmem>>, vector<1x8x64xbf16>
    %6 = vector.shape_cast %5 : vector<1x8x64xbf16> to vector<8x64xbf16>
    %c1_7 = arith.constant 1 : index
    %c0_8 = arith.constant 0 : index
    %c0_9 = arith.constant 0 : index
    %7 = vector.load %arg2[%c1_7, %c0_8, %c0_9] : memref<9x64x32xbf16, #tpu.memory_space<vmem>>, vector<1x64x32xbf16>
    %8 = vector.shape_cast %7 : vector<1x64x32xbf16> to vector<64x32xbf16>
    %cst_10 = arith.constant dense<0.000000e+00> : vector<8x32xf32>
    %9 = tpu.matmul %6, %8, %cst_10 {dimension_numbers = #tpu.dot_dimension_numbers<[1], [0], [0], [1], [0, 0, 1, 1], [], []>} : vector<8x64xbf16>, vector<64x32xbf16>, vector<8x32xf32> -> vector<8x32xf32>
    %10 = arith.addf %4, %9 : vector<8x32xf32>
    %c2 = arith.constant 2 : index
    %c0_11 = arith.constant 0 : index
    %c0_12 = arith.constant 0 : index
    %11 = vector.load %arg1[%c2, %c0_11, %c0_12] : memref<9x8x64xbf16, #tpu.memory_space<vmem>>, vector<1x8x64xbf16>
    %12 = vector.shape_cast %11 : vector<1x8x64xbf16> to vector<8x64xbf16>
    %c2_13 = arith.constant 2 : index
    %c0_14 = arith.constant 0 : index
    %c0_15 = arith.constant 0 : index
    %13 = vector.load %arg2[%c2_13, %c0_14, %c0_15] : memref<9x64x32xbf16, #tpu.memory_space<vmem>>, vector<1x64x32xbf16>
    %14 = vector.shape_cast %13 : vector<1x64x32xbf16> to vector<64x32xbf16>
    %cst_16 = arith.constant dense<0.000000e+00> : vector<8x32xf32>
    %15 = tpu.matmul %12, %14, %cst_16 {dimension_numbers = #tpu.dot_dimension_numbers<[1], [0], [0], [1], [0, 0, 1, 1], [], []>} : vector<8x64xbf16>, vector<64x32xbf16>, vector<8x32xf32> -> vector<8x32xf32>
    %16 = arith.addf %10, %15 : vector<8x32xf32>
    %c3 = arith.constant 3 : index
    %c0_17 = arith.constant 0 : index
    %c0_18 = arith.constant 0 : index
    %17 = vector.load %arg1[%c3, %c0_17, %c0_18] : memref<9x8x64xbf16, #tpu.memory_space<vmem>>, vector<1x8x64xbf16>
    %18 = vector.shape_cast %17 : vector<1x8x64xbf16> to vector<8x64xbf16>
    %c3_19 = arith.constant 3 : index
    %c0_20 = arith.constant 0 : index
    %c0_21 = arith.constant 0 : index
    %19 = vector.load %arg2[%c3_19, %c0_20, %c0_21] : memref<9x64x32xbf16, #tpu.memory_space<vmem>>, vector<1x64x32xbf16>
    %20 = vector.shape_cast %19 : vector<1x64x32xbf16> to vector<64x32xbf16>
    %cst_22 = arith.constant dense<0.000000e+00> : vector<8x32xf32>
    %21 = tpu.matmul %18, %20, %cst_22 {dimension_numbers = #tpu.dot_dimension_numbers<[1], [0], [0], [1], [0, 0, 1, 1], [], []>} : vector<8x64xbf16>, vector<64x32xbf16>, vector<8x32xf32> -> vector<8x32xf32>
    %22 = arith.addf %16, %21 : vector<8x32xf32>
    %c4 = arith.constant 4 : index
    %c0_23 = arith.constant 0 : index
    %c0_24 = arith.constant 0 : index
    %23 = vector.load %arg1[%c4, %c0_23, %c0_24] : memref<9x8x64xbf16, #tpu.memory_space<vmem>>, vector<1x8x64xbf16>
    %24 = vector.shape_cast %23 : vector<1x8x64xbf16> to vector<8x64xbf16>
    %c4_25 = arith.constant 4 : index
    %c0_26 = arith.constant 0 : index
    %c0_27 = arith.constant 0 : index
    %25 = vector.load %arg2[%c4_25, %c0_26, %c0_27] : memref<9x64x32xbf16, #tpu.memory_space<vmem>>, vector<1x64x32xbf16>
    %26 = vector.shape_cast %25 : vector<1x64x32xbf16> to vector<64x32xbf16>
    %cst_28 = arith.constant dense<0.000000e+00> : vector<8x32xf32>
    %27 = tpu.matmul %24, %26, %cst_28 {dimension_numbers = #tpu.dot_dimension_numbers<[1], [0], [0], [1], [0, 0, 1, 1], [], []>} : vector<8x64xbf16>, vector<64x32xbf16>, vector<8x32xf32> -> vector<8x32xf32>
    %28 = arith.addf %22, %27 : vector<8x32xf32>
    %c5 = arith.constant 5 : index
    %c0_29 = arith.constant 0 : index
    %c0_30 = arith.constant 0 : index
    %29 = vector.load %arg1[%c5, %c0_29, %c0_30] : memref<9x8x64xbf16, #tpu.memory_space<vmem>>, vector<1x8x64xbf16>
    %30 = vector.shape_cast %29 : vector<1x8x64xbf16> to vector<8x64xbf16>
    %c5_31 = arith.constant 5 : index
    %c0_32 = arith.constant 0 : index
    %c0_33 = arith.constant 0 : index
    %31 = vector.load %arg2[%c5_31, %c0_32, %c0_33] : memref<9x64x32xbf16, #tpu.memory_space<vmem>>, vector<1x64x32xbf16>
    %32 = vector.shape_cast %31 : vector<1x64x32xbf16> to vector<64x32xbf16>
    %cst_34 = arith.constant dense<0.000000e+00> : vector<8x32xf32>
    %33 = tpu.matmul %30, %32, %cst_34 {dimension_numbers = #tpu.dot_dimension_numbers<[1], [0], [0], [1], [0, 0, 1, 1], [], []>} : vector<8x64xbf16>, vector<64x32xbf16>, vector<8x32xf32> -> vector<8x32xf32>
    %34 = arith.addf %28, %33 : vector<8x32xf32>
    %c6 = arith.constant 6 : index
    %c0_35 = arith.constant 0 : index
    %c0_36 = arith.constant 0 : index
    %35 = vector.load %arg1[%c6, %c0_35, %c0_36] : memref<9x8x64xbf16, #tpu.memory_space<vmem>>, vector<1x8x64xbf16>
    %36 = vector.shape_cast %35 : vector<1x8x64xbf16> to vector<8x64xbf16>
    %c6_37 = arith.constant 6 : index
    %c0_38 = arith.constant 0 : index
    %c0_39 = arith.constant 0 : index
    %37 = vector.load %arg2[%c6_37, %c0_38, %c0_39] : memref<9x64x32xbf16, #tpu.memory_space<vmem>>, vector<1x64x32xbf16>
    %38 = vector.shape_cast %37 : vector<1x64x32xbf16> to vector<64x32xbf16>
    %cst_40 = arith.constant dense<0.000000e+00> : vector<8x32xf32>
    %39 = tpu.matmul %36, %38, %cst_40 {dimension_numbers = #tpu.dot_dimension_numbers<[1], [0], [0], [1], [0, 0, 1, 1], [], []>} : vector<8x64xbf16>, vector<64x32xbf16>, vector<8x32xf32> -> vector<8x32xf32>
    %40 = arith.addf %34, %39 : vector<8x32xf32>
    %c7 = arith.constant 7 : index
    %c0_41 = arith.constant 0 : index
    %c0_42 = arith.constant 0 : index
    %41 = vector.load %arg1[%c7, %c0_41, %c0_42] : memref<9x8x64xbf16, #tpu.memory_space<vmem>>, vector<1x8x64xbf16>
    %42 = vector.shape_cast %41 : vector<1x8x64xbf16> to vector<8x64xbf16>
    %c7_43 = arith.constant 7 : index
    %c0_44 = arith.constant 0 : index
    %c0_45 = arith.constant 0 : index
    %43 = vector.load %arg2[%c7_43, %c0_44, %c0_45] : memref<9x64x32xbf16, #tpu.memory_space<vmem>>, vector<1x64x32xbf16>
    %44 = vector.shape_cast %43 : vector<1x64x32xbf16> to vector<64x32xbf16>
    %cst_46 = arith.constant dense<0.000000e+00> : vector<8x32xf32>
    %45 = tpu.matmul %42, %44, %cst_46 {dimension_numbers = #tpu.dot_dimension_numbers<[1], [0], [0], [1], [0, 0, 1, 1], [], []>} : vector<8x64xbf16>, vector<64x32xbf16>, vector<8x32xf32> -> vector<8x32xf32>
    %46 = arith.addf %40, %45 : vector<8x32xf32>
    %c8 = arith.constant 8 : index
    %c0_47 = arith.constant 0 : index
    %c0_48 = arith.constant 0 : index
    %47 = vector.load %arg1[%c8, %c0_47, %c0_48] : memref<9x8x64xbf16, #tpu.memory_space<vmem>>, vector<1x8x64xbf16>
    %48 = vector.shape_cast %47 : vector<1x8x64xbf16> to vector<8x64xbf16>
    %c8_49 = arith.constant 8 : index
    %c0_50 = arith.constant 0 : index
    %c0_51 = arith.constant 0 : index
    %49 = vector.load %arg2[%c8_49, %c0_50, %c0_51] : memref<9x64x32xbf16, #tpu.memory_space<vmem>>, vector<1x64x32xbf16>
    %50 = vector.shape_cast %49 : vector<1x64x32xbf16> to vector<64x32xbf16>
    %cst_52 = arith.constant dense<0.000000e+00> : vector<8x32xf32>
    %51 = tpu.matmul %48, %50, %cst_52 {dimension_numbers = #tpu.dot_dimension_numbers<[1], [0], [0], [1], [0, 0, 1, 1], [], []>} : vector<8x64xbf16>, vector<64x32xbf16>, vector<8x32xf32> -> vector<8x32xf32>
    %52 = arith.addf %46, %51 : vector<8x32xf32>
    %c0_53 = arith.constant 0 : index
    %c0_54 = arith.constant 0 : index
    %53 = vector.load %arg3[%c0_53, %c0_54] : memref<1x32xf32, #tpu.memory_space<vmem>>, vector<1x32xf32>
    %54 = vector.broadcast %53 : vector<1x32xf32> to vector<8x32xf32>
    %55 = arith.addf %52, %54 : vector<8x32xf32>
    %cst_55 = arith.constant 0.000000e+00 : f32
    %56 = vector.broadcast %cst_55 : f32 to vector<8x32xf32>
    %57 = arith.maximumf %55, %56 : vector<8x32xf32>
    %58 = arith.truncf %57 : vector<8x32xf32> to vector<8x32xbf16>
    %c0_56 = arith.constant 0 : index
    %c0_57 = arith.constant 0 : index
    %59 = vector.load %arg4[%c0_56, %c0_57] : memref<8x32xbf16, #tpu.memory_space<vmem>>, vector<8x32xbf16>
    tpu.vector_store %arg4[%c0_56, %c0_57], %58 {strides = array<i32>} : memref<8x32xbf16, #tpu.memory_space<vmem>>, vector<8x32xbf16>,
    return
  }
  func.func @transform_0(%arg0: i32) -> (i32, i32, i32) {
    %c0_i32 = arith.constant 0 : i32
    %c0_i32_0 = arith.constant 0 : i32
    %c0_i32_1 = arith.constant 0 : i32
    return %c0_i32, %arg0, %c0_i32_0 : i32, i32, i32
  }
  func.func @transform_1(%arg0: i32) -> (i32, i32, i32) {
    %c0_i32 = arith.constant 0 : i32
    %c0_i32_0 = arith.constant 0 : i32
    %c0_i32_1 = arith.constant 0 : i32
    %c0_i32_2 = arith.constant 0 : i32
    return %c0_i32, %c0_i32_0, %c0_i32_1 : i32, i32, i32
  }
  func.func @transform_2(%arg0: i32) -> (i32, i32) {
    %c0_i32 = arith.constant 0 : i32
    %c0_i32_0 = arith.constant 0 : i32
    %c0_i32_1 = arith.constant 0 : i32
    return %c0_i32, %c0_i32_0 : i32, i32
  }
  func.func @transform_3(%arg0: i32) -> (i32, i32) {
    %c0_i32 = arith.constant 0 : i32
    %c0_i32_0 = arith.constant 0 : i32
    return %arg0, %c0_i32 : i32, i32
  }
}

module attributes {stable_mosaic.version = 11 : i64} {
  func.func @_maxpool_kernel(%arg0: i32, %arg1: memref<9x8x64xbf16, #tpu.memory_space<vmem>>, %arg2: memref<8x64xbf16, #tpu.memory_space<vmem>>) attributes {dimension_semantics = [#tpu.dimension_semantics<parallel>], iteration_bounds = array<i64: 1>, scalar_prefetch = 0 : i64, scratch_operands = 0 : i64, tpu.core_type = #tpu.core_type<tc>, window_params = [{transform_indices = @transform_0, window_bounds = array<i64: 9, 8, 64>}, {transform_indices = @transform_1, window_bounds = array<i64: 8, 64>}]} {
    %c0 = arith.constant 0 : index
    %c0_0 = arith.constant 0 : index
    %c0_1 = arith.constant 0 : index
    %0 = vector.load %arg1[%c0, %c0_0, %c0_1] : memref<9x8x64xbf16, #tpu.memory_space<vmem>>, vector<1x8x64xbf16>
    %1 = vector.shape_cast %0 : vector<1x8x64xbf16> to vector<8x64xbf16>
    %c1 = arith.constant 1 : index
    %c0_2 = arith.constant 0 : index
    %c0_3 = arith.constant 0 : index
    %2 = vector.load %arg1[%c1, %c0_2, %c0_3] : memref<9x8x64xbf16, #tpu.memory_space<vmem>>, vector<1x8x64xbf16>
    %3 = vector.shape_cast %2 : vector<1x8x64xbf16> to vector<8x64xbf16>
    %4 = arith.maximumf %1, %3 : vector<8x64xbf16>
    %c2 = arith.constant 2 : index
    %c0_4 = arith.constant 0 : index
    %c0_5 = arith.constant 0 : index
    %5 = vector.load %arg1[%c2, %c0_4, %c0_5] : memref<9x8x64xbf16, #tpu.memory_space<vmem>>, vector<1x8x64xbf16>
    %6 = vector.shape_cast %5 : vector<1x8x64xbf16> to vector<8x64xbf16>
    %7 = arith.maximumf %4, %6 : vector<8x64xbf16>
    %c3 = arith.constant 3 : index
    %c0_6 = arith.constant 0 : index
    %c0_7 = arith.constant 0 : index
    %8 = vector.load %arg1[%c3, %c0_6, %c0_7] : memref<9x8x64xbf16, #tpu.memory_space<vmem>>, vector<1x8x64xbf16>
    %9 = vector.shape_cast %8 : vector<1x8x64xbf16> to vector<8x64xbf16>
    %10 = arith.maximumf %7, %9 : vector<8x64xbf16>
    %c4 = arith.constant 4 : index
    %c0_8 = arith.constant 0 : index
    %c0_9 = arith.constant 0 : index
    %11 = vector.load %arg1[%c4, %c0_8, %c0_9] : memref<9x8x64xbf16, #tpu.memory_space<vmem>>, vector<1x8x64xbf16>
    %12 = vector.shape_cast %11 : vector<1x8x64xbf16> to vector<8x64xbf16>
    %13 = arith.maximumf %10, %12 : vector<8x64xbf16>
    %c5 = arith.constant 5 : index
    %c0_10 = arith.constant 0 : index
    %c0_11 = arith.constant 0 : index
    %14 = vector.load %arg1[%c5, %c0_10, %c0_11] : memref<9x8x64xbf16, #tpu.memory_space<vmem>>, vector<1x8x64xbf16>
    %15 = vector.shape_cast %14 : vector<1x8x64xbf16> to vector<8x64xbf16>
    %16 = arith.maximumf %13, %15 : vector<8x64xbf16>
    %c6 = arith.constant 6 : index
    %c0_12 = arith.constant 0 : index
    %c0_13 = arith.constant 0 : index
    %17 = vector.load %arg1[%c6, %c0_12, %c0_13] : memref<9x8x64xbf16, #tpu.memory_space<vmem>>, vector<1x8x64xbf16>
    %18 = vector.shape_cast %17 : vector<1x8x64xbf16> to vector<8x64xbf16>
    %19 = arith.maximumf %16, %18 : vector<8x64xbf16>
    %c7 = arith.constant 7 : index
    %c0_14 = arith.constant 0 : index
    %c0_15 = arith.constant 0 : index
    %20 = vector.load %arg1[%c7, %c0_14, %c0_15] : memref<9x8x64xbf16, #tpu.memory_space<vmem>>, vector<1x8x64xbf16>
    %21 = vector.shape_cast %20 : vector<1x8x64xbf16> to vector<8x64xbf16>
    %22 = arith.maximumf %19, %21 : vector<8x64xbf16>
    %c8 = arith.constant 8 : index
    %c0_16 = arith.constant 0 : index
    %c0_17 = arith.constant 0 : index
    %23 = vector.load %arg1[%c8, %c0_16, %c0_17] : memref<9x8x64xbf16, #tpu.memory_space<vmem>>, vector<1x8x64xbf16>
    %24 = vector.shape_cast %23 : vector<1x8x64xbf16> to vector<8x64xbf16>
    %25 = arith.maximumf %22, %24 : vector<8x64xbf16>
    %c0_18 = arith.constant 0 : index
    %c0_19 = arith.constant 0 : index
    %26 = vector.load %arg2[%c0_18, %c0_19] : memref<8x64xbf16, #tpu.memory_space<vmem>>, vector<8x64xbf16>
    tpu.vector_store %arg2[%c0_18, %c0_19], %25 {strides = array<i32>} : memref<8x64xbf16, #tpu.memory_space<vmem>>, vector<8x64xbf16>,
    return
  }
  func.func @transform_0(%arg0: i32) -> (i32, i32, i32) {
    %c0_i32 = arith.constant 0 : i32
    %c0_i32_0 = arith.constant 0 : i32
    %c0_i32_1 = arith.constant 0 : i32
    return %c0_i32, %arg0, %c0_i32_0 : i32, i32, i32
  }
  func.func @transform_1(%arg0: i32) -> (i32, i32) {
    %c0_i32 = arith.constant 0 : i32
    %c0_i32_0 = arith.constant 0 : i32
    return %arg0, %c0_i32 : i32, i32
  }
}

module attributes {stable_mosaic.version = 11 : i64} {
  func.func @_fused_1x1_kernel(%arg0: i32, %arg1: memref<8x32xbf16, #tpu.memory_space<vmem>>, %arg2: memref<32x32xbf16, #tpu.memory_space<vmem>>, %arg3: memref<1x32xf32, #tpu.memory_space<vmem>>, %arg4: memref<32x2xbf16, #tpu.memory_space<vmem>>, %arg5: memref<1x2xf32, #tpu.memory_space<vmem>>, %arg6: memref<8x2xf32, #tpu.memory_space<vmem>>) attributes {dimension_semantics = [#tpu.dimension_semantics<parallel>], iteration_bounds = array<i64: 1>, scalar_prefetch = 0 : i64, scratch_operands = 0 : i64, tpu.core_type = #tpu.core_type<tc>, window_params = [{transform_indices = @transform_0, window_bounds = array<i64: 8, 32>}, {pipeline_mode = #tpu.pipeline_mode<synchronous>, transform_indices = @transform_1, window_bounds = array<i64: 32, 32>}, {pipeline_mode = #tpu.pipeline_mode<synchronous>, transform_indices = @transform_2, window_bounds = array<i64: 1, 32>}, {pipeline_mode = #tpu.pipeline_mode<synchronous>, transform_indices = @transform_3, window_bounds = array<i64: 32, 2>}, {pipeline_mode = #tpu.pipeline_mode<synchronous>, transform_indices = @transform_4, window_bounds = array<i64: 1, 2>}, {transform_indices = @transform_5, window_bounds = array<i64: 8, 2>}]} {
    %c0 = arith.constant 0 : index
    %c0_0 = arith.constant 0 : index
    %0 = vector.load %arg1[%c0, %c0_0] : memref<8x32xbf16, #tpu.memory_space<vmem>>, vector<8x32xbf16>
    %c0_1 = arith.constant 0 : index
    %c0_2 = arith.constant 0 : index
    %1 = vector.load %arg2[%c0_1, %c0_2] : memref<32x32xbf16, #tpu.memory_space<vmem>>, vector<32x32xbf16>
    %cst = arith.constant dense<0.000000e+00> : vector<8x32xf32>
    %2 = tpu.matmul %0, %1, %cst {dimension_numbers = #tpu.dot_dimension_numbers<[1], [0], [0], [1], [0, 0, 1, 1], [], []>} : vector<8x32xbf16>, vector<32x32xbf16>, vector<8x32xf32> -> vector<8x32xf32>
    %c0_3 = arith.constant 0 : index
    %c0_4 = arith.constant 0 : index
    %3 = vector.load %arg3[%c0_3, %c0_4] : memref<1x32xf32, #tpu.memory_space<vmem>>, vector<1x32xf32>
    %4 = vector.broadcast %3 : vector<1x32xf32> to vector<8x32xf32>
    %5 = arith.addf %2, %4 : vector<8x32xf32>
    %cst_5 = arith.constant 0.000000e+00 : f32
    %6 = vector.broadcast %cst_5 : f32 to vector<8x32xf32>
    %7 = arith.maximumf %5, %6 : vector<8x32xf32>
    %8 = arith.truncf %7 : vector<8x32xf32> to vector<8x32xbf16>
    %c0_6 = arith.constant 0 : index
    %c0_7 = arith.constant 0 : index
    %9 = vector.load %arg4[%c0_6, %c0_7] : memref<32x2xbf16, #tpu.memory_space<vmem>>, vector<32x2xbf16>
    %cst_8 = arith.constant dense<0.000000e+00> : vector<8x2xf32>
    %10 = tpu.matmul %8, %9, %cst_8 {dimension_numbers = #tpu.dot_dimension_numbers<[1], [0], [0], [1], [0, 0, 1, 1], [], []>} : vector<8x32xbf16>, vector<32x2xbf16>, vector<8x2xf32> -> vector<8x2xf32>
    %c0_9 = arith.constant 0 : index
    %c0_10 = arith.constant 0 : index
    %11 = vector.load %arg5[%c0_9, %c0_10] : memref<1x2xf32, #tpu.memory_space<vmem>>, vector<1x2xf32>
    %12 = vector.broadcast %11 : vector<1x2xf32> to vector<8x2xf32>
    %13 = arith.addf %10, %12 : vector<8x2xf32>
    %c0_11 = arith.constant 0 : index
    %c0_12 = arith.constant 0 : index
    %14 = vector.load %arg6[%c0_11, %c0_12] : memref<8x2xf32, #tpu.memory_space<vmem>>, vector<8x2xf32>
    tpu.vector_store %arg6[%c0_11, %c0_12], %13 {strides = array<i32>} : memref<8x2xf32, #tpu.memory_space<vmem>>, vector<8x2xf32>,
    return
  }
  func.func @transform_0(%arg0: i32) -> (i32, i32) {
    %c0_i32 = arith.constant 0 : i32
    %c0_i32_0 = arith.constant 0 : i32
    return %arg0, %c0_i32 : i32, i32
  }
  func.func @transform_1(%arg0: i32) -> (i32, i32) {
    %c0_i32 = arith.constant 0 : i32
    %c0_i32_0 = arith.constant 0 : i32
    %c0_i32_1 = arith.constant 0 : i32
    return %c0_i32, %c0_i32_0 : i32, i32
  }
  func.func @transform_2(%arg0: i32) -> (i32, i32) {
    %c0_i32 = arith.constant 0 : i32
    %c0_i32_0 = arith.constant 0 : i32
    %c0_i32_1 = arith.constant 0 : i32
    return %c0_i32, %c0_i32_0 : i32, i32
  }
  func.func @transform_3(%arg0: i32) -> (i32, i32) {
    %c0_i32 = arith.constant 0 : i32
    %c0_i32_0 = arith.constant 0 : i32
    %c0_i32_1 = arith.constant 0 : i32
    return %c0_i32, %c0_i32_0 : i32, i32
  }
  func.func @transform_4(%arg0: i32) -> (i32, i32) {
    %c0_i32 = arith.constant 0 : i32
    %c0_i32_0 = arith.constant 0 : i32
    %c0_i32_1 = arith.constant 0 : i32
    return %c0_i32, %c0_i32_0 : i32, i32
  }
  func.func @transform_5(%arg0: i32) -> (i32, i32) {
    %c0_i32 = arith.constant 0 : i32
    %c0_i32_0 = arith.constant 0 : i32
    return %arg0, %c0_i32 : i32, i32
  }
}

</mosaic_0001>

<bundles_post_ra>
// kernel: discriminator_forward.5
= control target key start
LH: loop header
LB: loop body
LE: loop exit
PB: predicated region body
PF: predicated region fallthrough
CT: control target
= control target key end

     0   :  { %vm116_vm0 = vcmask 1041408   ;;  %vm91_vm1 = vcmask 31744   ;;  %vm1877_vm2 = vcmask 781312   ;;  %s3166_s1 = inlined_call_operand.vmem [shape: bf16[9,4,96], index: 1, kind: input, shape index: {}]   ;;  %s3167_s0 = inlined_call_operand.vmem [shape: bf16[9,128,4], index: 0, kind: input, shape index: {}]   ;;  %s3168_s2 = inlined_call_operand.vmem [shape: f32[1,96], index: 2, kind: input, shape index: {}]   ;;  %s3169_s3 = inlined_call_operand.vmem [shape: bf16[128,96], index: 3, kind: output, shape index: {}]  }
   0x1   :  { %v1914_v0 = vld [vmem:[%s3166_s1 + $0x2] sm:$0x3]  ;;  %v2468_v4 = vld [vmem:[%s3167_s0 + $0x48] sm:$0xff]   ;;  %v31_v6 = vld [vmem:[%s3166_s1] sm:$0x3] }
   0x2   :  { %2456 = vmatprep.subr.msk.bf16.mxu0 %vm116_vm0, %v1914_v0  ;;  %2457 = vmatprep.subr.msk.bf16.mxu1 %vm116_vm0, %v1914_v0  ;;  %v118_v1 = vsel %vm116_vm0, %v1914_v0, 0  ;;  %v2466_v2 = vld [vmem:[%s3167_s0 + $0x40] sm:$0xff]   ;;  %v2469_v5 = vld [vmem:[%s3167_s0 + $0x68] sm:$0xff]   ;;  %v282_v8 = vsel %vm116_vm0, %v31_v6, 0  ;;  %v2470_v10 = vld [vmem:[%s3167_s0 + $0x50] sm:$0xff]  }
   0x3   :  { %2293 = vmatpush3.bf16.msra.mxu0 %v118_v1  ;;  %2455 = vmatpush3.bf16.msra.mxu1 %v118_v1  ;;  %v2467_v3 = vld [vmem:[%s3167_s0 + $0x60] sm:$0xff]   ;;  %v2471_v11 = vld [vmem:[%s3167_s0 + $0x70] sm:$0xff]   ;;  %v2472_v12 = vld [vmem:[%s3167_s0 + $0x58] sm:$0xff]  }
   0x4   :  { %2294 = vmatprep.mubr.msk.bf16.mxu0 %vm91_vm1, %v2466_v2  ;;  %2302 = vmatprep.mubr.msk.bf16.mxu1 %vm91_vm1, %v2467_v3  ;;  %v1963_v7 = vld [vmem:[%s3166_s1 + $0x4] sm:$0x3]  ;;  %v2473_v13 = vld [vmem:[%s3167_s0 + $0x78] sm:$0xff]   ;;  %v1996_v16 = vld [vmem:[%s3166_s1 + $0x6] sm:$0x3] }
   0x5   :  { %2458 = vmatprep.subr.msk.bf16.mxu1 %vm116_vm0, %v31_v6  ;;  %v465_v9 = vsel %vm116_vm0, %v1963_v7, 0  ;;  %2459 = vmatprep.subr.msk.bf16.mxu0 %vm116_vm0, %v1963_v7  ;;  %v2474_v14 = vld [vmem:[%s3167_s0] sm:$0xff]   ;;  %v2029_v17 = vld [vmem:[%s3166_s1 + $0x8] sm:$0x3]  ;;  %v2478_v21 = vld [vmem:[%s3167_s0 + $0x10] sm:$0xff]   ;;  %v664_v22 = vsel %vm116_vm0, %v1996_v16, 0 }
   0x6   :  { %2295 = vmatmul.mubr.msk.bf16.vlgmr.msra.gmra.mxu0 %vm91_vm1, %v2468_v4  ;;  %2303 = vmatmul.mubr.msk.bf16.vlgmr.msra.gmra.mxu1 %vm91_vm1, %v2469_v5  ;;  %v2475_v15 = vld [vmem:[%s3167_s0 + $0x80] sm:$0xff]   ;;  %v2477_v18 = vld [vmem:[%s3167_s0 + $0x88] sm:$0xff]   ;;  %v863_v20 = vsel %vm116_vm0, %v2029_v17, 0  ;;  %v2479_v23 = vld [vmem:[%s3167_s0 + $0x90] sm:$0xff]  }
   0x7   :  { %2311 = vmatpush3.bf16.msra.mxu1 %v282_v8  ;;  %2329 = vmatpush3.bf16.msra.mxu0 %v465_v9  ;;  %v2476_v19 = vld [vmem:[%s3167_s0 + $0x8] sm:$0xff]   ;;  %v2480_v24 = vld [vmem:[%s3167_s0 + $0x18] sm:$0xff]   ;;  %v2483_v26 = vld [vmem:[%s3167_s0 + $0xa0] sm:$0xff]  }
   0x8   :  { %2298 = vmatprep.mubr.msk.bf16.mxu0 %vm91_vm1, %v2470_v10  ;;  %2306 = vmatprep.mubr.msk.bf16.mxu1 %vm91_vm1, %v2471_v11  ;;  %v2481_v25 = vld [vmem:[%s3167_s0 + $0x98] sm:$0xff]   ;;  %v2482_v27 = vld [vmem:[%s3167_s0 + $0x20] sm:$0xff]   ;;  %v2062_v28 = vld [vmem:[%s3166_s1 + $0xa] sm:$0x3] }
   0x9   :  { %2460 = vmatprep.subr.msk.bf16.mxu1 %vm116_vm0, %v1996_v16  ;;  %2461 = vmatprep.subr.msk.bf16.mxu0 %vm116_vm0, %v2029_v17  ;;  %v2095_v29 = vld [vmem:[%s3166_s1 + $0xc] sm:$0x3]  ;;  %v2487_v32 = vld [vmem:[%s3167_s0 + $0xb0] sm:$0xff]   ;;  %v2488_v34 = vld [vmem:[%s3167_s0 + $0x38] sm:$0xff]   ;;  %v1062_v42 = vsel %vm116_vm0, %v2062_v28, 0 }
   0xa   :  { %v2484_v30 = vld [vmem:[%s3167_s0 + $0x28] sm:$0xff]   ;;  %v2486_v33 = vld [vmem:[%s3167_s0 + $0x30] sm:$0xff]   ;;  %v2489_v35 = vld [vmem:[%s3167_s0 + $0xb8] sm:$0xff]   ;;  %v1261_v40 = vsel %vm116_vm0, %v2095_v29, 0 }
   0xb   :  { %v2485_v31 = vld [vmem:[%s3167_s0 + $0xa8] sm:$0xff]   ;;  %v2491_v36 = vld [vmem:[%s3167_s0 + $0x100] sm:$0xff]   ;;  %v2494_v41 = vld [vmem:[%s3167_s0 + $0xd0] sm:$0xff]  }
   0xc   :  { %v2490_v37 = vld [vmem:[%s3167_s0 + $0xc0] sm:$0xff]   ;;  %v2493_v38 = vld [vmem:[%s3167_s0 + $0x108] sm:$0xff]   ;;  %v2495_v43 = vld [vmem:[%s3167_s0 + $0x110] sm:$0xff]  }
   0xd   :  { %v2492_v39 = vld [vmem:[%s3167_s0 + $0xc8] sm:$0xff]   ;;  %v2161_v45 = vld [vmem:[%s3166_s1 + $0x10] sm:$0x3]  ;;  %v2496_v46 = vld [vmem:[%s3167_s0 + $0xd8] sm:$0xff]  }
   0xe   :  { %2299 = vmatmul.mubr.msk.bf16.gmra.mxu0 %vm91_vm1, %v2472_v12  ;;  %2307 = vmatmul.mubr.msk.bf16.gmra.mxu1 %vm91_vm1, %v2473_v13  ;;  %v2128_v44 = vld [vmem:[%s3166_s1 + $0xe] sm:$0x3]  ;;  %v2497_v47 = vld [vmem:[%s3167_s0 + $0x118] sm:$0xff]   ;;  %v2499_v48 = vld [vmem:[%s3167_s0 + $0x120] sm:$0xff]   ;;  %v1659_v60 = vsel %vm116_vm0, %v2161_v45, 0 }
   0xf   :  { %2330 = vmatprep.mubr.msk.bf16.mxu0 %vm91_vm1, %v2475_v15  ;;  %2312 = vmatprep.mubr.msk.bf16.mxu1 %vm91_vm1, %v2474_v14  ;;  %v2498_v49 = vld [vmem:[%s3167_s0 + $0xe0] sm:$0xff]   ;;  %v2500_v50 = vld [vmem:[%s3167_s0 + $0xe8] sm:$0xff]   ;;  %v2503_v52 = vld [vmem:[%s3167_s0 + $0x130] sm:$0xff]   ;;  %v1460_v62 = vsel %vm116_vm0, %v2128_v44, 0 }
  0x10   :  { %v2501_v51 = vld [vmem:[%s3167_s0 + $0x128] sm:$0xff]   ;;  %v2502_v53 = vld [vmem:[%s3167_s0 + $0xf0] sm:$0xff]   ;;  %v2504_v54 = vld [vmem:[%s3167_s0 + $0xf8] sm:$0xff]  }
  0x11   :  { %v2505_v55 = vld [vmem:[%s3167_s0 + $0x138] sm:$0xff]   ;;  %v2507_v56 = vld [vmem:[%s3167_s0 + $0x180] sm:$0xff]   ;;  %v2509_v58 = vld [vmem:[%s3167_s0 + $0x188] sm:$0xff]  }
  0x12   :  { %v2506_v57 = vld [vmem:[%s3167_s0 + $0x140] sm:$0xff]   ;;  %v2508_v59 = vld [vmem:[%s3167_s0 + $0x148] sm:$0xff]   ;;  %v2510_v61 = vld [vmem:[%s3167_s0 + $0x150] sm:$0xff]  }
  0x13   :  { %v2511_v63 = vld [vmem:[%s3167_s0 + $0x190] sm:$0xff]   ;;  %v2513_v0 = vld [vmem:[%s3167_s0 + $0x198] sm:$0xff]   ;;  %v2515_v2 = vld [vmem:[%s3167_s0 + $0x1a0] sm:$0xff]  }
  0x14   :  { %v2512_v1 = vld [vmem:[%s3167_s0 + $0x158] sm:$0xff]   ;;  %v2514_v3 = vld [vmem:[%s3167_s0 + $0x160] sm:$0xff]   ;;  %v2517_v4 = vld [vmem:[%s3167_s0 + $0x1a8] sm:$0xff]  }
  0x15   :  { %v2516_v5 = vld [vmem:[%s3167_s0 + $0x168] sm:$0xff]   ;;  %v2519_v6 = vld [vmem:[%s3167_s0 + $0x1b0] sm:$0xff]   ;;  %v2521_v8 = vld [vmem:[%s3167_s0 + $0x1b8] sm:$0xff]  }
  0x16   :  { %2331 = vmatmul.mubr.msk.bf16.vlgmr.msra.gmra.mxu0 %vm91_vm1, %v2477_v18  ;;  %2313 = vmatmul.mubr.msk.bf16.vlgmr.msra.gmra.mxu1 %vm91_vm1, %v2476_v19  ;;  %v2518_v7 = vld [vmem:[%s3167_s0 + $0x170] sm:$0xff]   ;;  %v2520_v9 = vld [vmem:[%s3167_s0 + $0x178] sm:$0xff]   ;;  %v2523_v10 = vld [vmem:[%s3167_s0 + $0x200] sm:$0xff]  }
  0x17   :  { %2365 = vmatpush3.bf16.msra.mxu0 %v863_v20  ;;  %2347 = vmatpush3.bf16.msra.mxu1 %v664_v22  ;;  %v2522_v11 = vld [vmem:[%s3167_s0 + $0x1c0] sm:$0xff]   ;;  %v2525_v12 = vld [vmem:[%s3167_s0 + $0x208] sm:$0xff]   ;;  %v2527_v14 = vld [vmem:[%s3167_s0 + $0x210] sm:$0xff]  }
  0x18   :  { %2316 = vmatprep.mubr.msk.bf16.mxu1 %vm91_vm1, %v2478_v21  ;;  %2334 = vmatprep.mubr.msk.bf16.mxu0 %vm91_vm1, %v2479_v23  ;;  %v2524_v13 = vld [vmem:[%s3167_s0 + $0x1c8] sm:$0xff]   ;;  %v2526_v15 = vld [vmem:[%s3167_s0 + $0x1d0] sm:$0xff]   ;;  %v2529_v16 = vld [vmem:[%s3167_s0 + $0x218] sm:$0xff]  }
  0x19   :  { %2462 = vmatprep.subr.msk.bf16.mxu1 %vm116_vm0, %v2062_v28  ;;  %2463 = vmatprep.subr.msk.bf16.mxu0 %vm116_vm0, %v2095_v29  ;;  %v2528_v17 = vld [vmem:[%s3167_s0 + $0x1d8] sm:$0xff]   ;;  %v2531_v18 = vld [vmem:[%s3167_s0 + $0x220] sm:$0xff]   ;;  %v2533_v20 = vld [vmem:[%s3167_s0 + $0x228] sm:$0xff]  }
  0x1a   :  { %v2530_v19 = vld [vmem:[%s3167_s0 + $0x1e0] sm:$0xff]   ;;  %v2532_v21 = vld [vmem:[%s3167_s0 + $0x1e8] sm:$0xff]   ;;  %v2535_v22 = vld [vmem:[%s3167_s0 + $0x230] sm:$0xff]  }
  0x1b   :  { %v2534_v23 = vld [vmem:[%s3167_s0 + $0x1f0] sm:$0xff]  }
  0x1e   :  { %2335 = vmatmul.mubr.msk.bf16.gmra.mxu0 %vm91_vm1, %v2481_v25  ;;  %2317 = vmatmul.mubr.msk.bf16.gmra.mxu1 %vm91_vm1, %v2480_v24  ;;  %v2537_v24 = vld [vmem:[%s3167_s0 + $0x238] sm:$0xff]  }
  0x1f   :  { %2338 = vmatprep.mubr.msk.bf16.mxu0 %vm91_vm1, %v2483_v26  ;;  %2320 = vmatprep.mubr.msk.bf16.mxu1 %vm91_vm1, %v2482_v27  ;;  %v2536_v25 = vld [vmem:[%s3167_s0 + $0x1f8] sm:$0xff]  }
  0x26   :  { %2339 = vmatmul.mubr.msk.bf16.gmra.mxu0 %vm91_vm1, %v2485_v31  ;;  %2321 = vmatmul.mubr.msk.bf16.gmra.mxu1 %vm91_vm1, %v2484_v30 }
  0x27   :  { %2342 = vmatprep.mubr.msk.bf16.mxu0 %vm91_vm1, %v2487_v32  ;;  %2324 = vmatprep.mubr.msk.bf16.mxu1 %vm91_vm1, %v2486_v33 }
  0x2e   :  { %2343 = vmatmul.mubr.msk.bf16.gmra.mxu0 %vm91_vm1, %v2489_v35  ;;  %2325 = vmatmul.mubr.msk.bf16.gmra.mxu1 %vm91_vm1, %v2488_v34 }
  0x2f   :  { %2366 = vmatprep.mubr.msk.bf16.mxu0 %vm91_vm1, %v2491_v36  ;;  %2348 = vmatprep.mubr.msk.bf16.mxu1 %vm91_vm1, %v2490_v37 }
  0x36   :  { %2367 = vmatmul.mubr.msk.bf16.vlgmr.msra.gmra.mxu0 %vm91_vm1, %v2493_v38  ;;  %2349 = vmatmul.mubr.msk.bf16.vlgmr.msra.gmra.mxu1 %vm91_vm1, %v2492_v39 }
  0x37   :  { %2401 = vmatpush3.bf16.msra.mxu0 %v1261_v40  ;;  %2383 = vmatpush3.bf16.msra.mxu1 %v1062_v42 }
  0x38   :  { %2352 = vmatprep.mubr.msk.bf16.mxu1 %vm91_vm1, %v2494_v41  ;;  %2370 = vmatprep.mubr.msk.bf16.mxu0 %vm91_vm1, %v2495_v43 }
  0x39   :  { %2464 = vmatprep.subr.msk.bf16.mxu1 %vm116_vm0, %v2128_v44  ;;  %2465 = vmatprep.subr.msk.bf16.mxu0 %vm116_vm0, %v2161_v45 }
  0x3e   :  { %2371 = vmatmul.mubr.msk.bf16.gmra.mxu0 %vm91_vm1, %v2497_v47  ;;  %2353 = vmatmul.mubr.msk.bf16.gmra.mxu1 %vm91_vm1, %v2496_v46 }
  0x3f   :  { %2374 = vmatprep.mubr.msk.bf16.mxu0 %vm91_vm1, %v2499_v48  ;;  %2356 = vmatprep.mubr.msk.bf16.mxu1 %vm91_vm1, %v2498_v49 }
  0x46   :  { %2375 = vmatmul.mubr.msk.bf16.gmra.mxu0 %vm91_vm1, %v2501_v51  ;;  %2357 = vmatmul.mubr.msk.bf16.gmra.mxu1 %vm91_vm1, %v2500_v50 }
  0x47   :  { %2378 = vmatprep.mubr.msk.bf16.mxu0 %vm91_vm1, %v2503_v52  ;;  %2360 = vmatprep.mubr.msk.bf16.mxu1 %vm91_vm1, %v2502_v53 }
  0x4e   :  { %2379 = vmatmul.mubr.msk.bf16.gmra.mxu0 %vm91_vm1, %v2505_v55  ;;  %2361 = vmatmul.mubr.msk.bf16.gmra.mxu1 %vm91_vm1, %v2504_v54 }
  0x4f   :  { %2402 = vmatprep.mubr.msk.bf16.mxu0 %vm91_vm1, %v2507_v56  ;;  %2384 = vmatprep.mubr.msk.bf16.mxu1 %vm91_vm1, %v2506_v57 }
  0x56   :  { %2403 = vmatmul.mubr.msk.bf16.vlgmr.msra.gmra.mxu0 %vm91_vm1, %v2509_v58  ;;  %2385 = vmatmul.mubr.msk.bf16.vlgmr.msra.gmra.mxu1 %vm91_vm1, %v2508_v59 }
  0x57   :  { %2437 = vmatpush3.bf16.msra.mxu0 %v1659_v60  ;;  %2419 = vmatpush3.bf16.msra.mxu1 %v1460_v62 }
  0x58   :  { %2388 = vmatprep.mubr.msk.bf16.mxu1 %vm91_vm1, %v2510_v61  ;;  %2406 = vmatprep.mubr.msk.bf16.mxu0 %vm91_vm1, %v2511_v63 }
  0x5e   :  { %2407 = vmatmul.mubr.msk.bf16.gmra.mxu0 %vm91_vm1, %v2513_v0  ;;  %2389 = vmatmul.mubr.msk.bf16.gmra.mxu1 %vm91_vm1, %v2512_v1 }
  0x5f   :  { %2410 = vmatprep.mubr.msk.bf16.mxu0 %vm91_vm1, %v2515_v2  ;;  %2392 = vmatprep.mubr.msk.bf16.mxu1 %vm91_vm1, %v2514_v3 }
  0x66   :  { %2411 = vmatmul.mubr.msk.bf16.gmra.mxu0 %vm91_vm1, %v2517_v4  ;;  %2393 = vmatmul.mubr.msk.bf16.gmra.mxu1 %vm91_vm1, %v2516_v5 }
  0x67   :  { %2414 = vmatprep.mubr.msk.bf16.mxu0 %vm91_vm1, %v2519_v6  ;;  %2396 = vmatprep.mubr.msk.bf16.mxu1 %vm91_vm1, %v2518_v7 }
  0x6e   :  { %2415 = vmatmul.mubr.msk.bf16.gmra.mxu0 %vm91_vm1, %v2521_v8  ;;  %2397 = vmatmul.mubr.msk.bf16.gmra.mxu1 %vm91_vm1, %v2520_v9 }
  0x6f   :  { %2438 = vmatprep.mubr.msk.bf16.mxu0 %vm91_vm1, %v2523_v10  ;;  %2420 = vmatprep.mubr.msk.bf16.mxu1 %vm91_vm1, %v2522_v11 }
  0x76   :  { %2439 = vmatmul.mubr.msk.bf16.vlgmr.msra.gmra.mxu0 %vm91_vm1, %v2525_v12  ;;  %2421 = vmatmul.mubr.msk.bf16.vlgmr.msra.gmra.mxu1 %vm91_vm1, %v2524_v13 }
  0x77   :  { %2442 = vmatprep.mubr.msk.bf16.mxu0 %vm91_vm1, %v2527_v14  ;;  %2424 = vmatprep.mubr.msk.bf16.mxu1 %vm91_vm1, %v2526_v15 }
  0x7e   :  { %2443 = vmatmul.mubr.msk.bf16.gmra.mxu0 %vm91_vm1, %v2529_v16  ;;  %2425 = vmatmul.mubr.msk.bf16.gmra.mxu1 %vm91_vm1, %v2528_v17 }
  0x7f   :  { %2446 = vmatprep.mubr.msk.bf16.mxu0 %vm91_vm1, %v2531_v18  ;;  %2428 = vmatprep.mubr.msk.bf16.mxu1 %vm91_vm1, %v2530_v19 }
  0x86   :  { %2447 = vmatmul.mubr.msk.bf16.gmra.mxu0 %vm91_vm1, %v2533_v20  ;;  %2429 = vmatmul.mubr.msk.bf16.gmra.mxu1 %vm91_vm1, %v2532_v21 }
  0x87   :  { %2450 = vmatprep.mubr.msk.bf16.mxu0 %vm91_vm1, %v2535_v22  ;;  %2432 = vmatprep.mubr.msk.bf16.mxu1 %vm91_vm1, %v2534_v23 }
  0x8e   :  { %2451 = vmatmul.mubr.msk.bf16.gmra.mxu0 %vm91_vm1, %v2537_v24  ;;  %2433 = vmatmul.mubr.msk.bf16.gmra.mxu1 %vm91_vm1, %v2536_v25 }
  0xc6   :  { %v2296_v26 = vpop.f32.mrf.mxu0  ;;  %v2304_v27 = vpop.f32.mrf.mxu1 }
  0xc8   :  { %v154_v28 = vpop.f32.mrf.mxu0  ;;  %v186_v29 = vpop.f32.mrf.mxu1 }
  0xca   :  { %v2297_v30 = vpop.f32.mrf.mxu0  ;;  %v2305_v31 = vpop.f32.mrf.mxu1 }
  0xcc   :  { %v157_v32 = vpop.f32.mrf.mxu0  ;;  %v189_v33 = vpop.f32.mrf.mxu1 }
  0xce   :  { %v2300_v34 = vpop.f32.mrf.mxu0  ;;  %v2308_v35 = vpop.f32.mrf.mxu1 }
  0xd0   :  { %v170_v36 = vpop.f32.mrf.mxu0  ;;  %v202_v37 = vpop.f32.mrf.mxu1 }
  0xd2   :  { %v2301_v38 = vpop.f32.mrf.mxu0  ;;  %v2309_v39 = vpop.f32.mrf.mxu1 }
  0xd4   :  { %v173_v40 = vpop.f32.mrf.mxu0  ;;  %v2892_v41 = vpop.f32.mrf.mxu1 }
  0xd6   :  { %v2332_v42 = vpop.f32.mrf.mxu0  ;;  %v2314_v43 = vpop.f32.mrf.mxu1 }
  0xd7   :  { %v327_v44 = vadd.f32 %v2314_v43, %v2296_v26 }
  0xd8   :  { %v501_v45 = vpop.f32.mrf.mxu0  ;;  %v318_v46 = vpop.f32.mrf.mxu1 }
  0xd9   :  { %v2894_v47 = vadd.f32 %v2332_v42, %v327_v44  ;;  %v319_v48 = vadd.f32 %v318_v46, %v154_v28 }
  0xda   :  { %v2333_v49 = vpop.f32.mrf.mxu0  ;;  %v2315_v50 = vpop.f32.mrf.mxu1 }
  0xdb   :  { %v2896_v51 = vadd.f32 %v501_v45, %v319_v48  ;;  %v330_v52 = vadd.f32 %v2315_v50, %v2297_v30 }
  0xdc   :  { %v504_v53 = vpop.f32.mrf.mxu0  ;;  %v321_v54 = vpop.f32.mrf.mxu1 }
  0xdd   :  { %v2898_v55 = vadd.f32 %v2333_v49, %v330_v52  ;;  %v322_v56 = vadd.f32 %v321_v54, %v157_v32 }
  0xde   :  { %v2336_v57 = vpop.f32.mrf.mxu0  ;;  %v2318_v58 = vpop.f32.mrf.mxu1 }
  0xdf   :  { %v2900_v59 = vadd.f32 %v504_v53, %v322_v56  ;;  %v343_v60 = vadd.f32 %v2318_v58, %v2300_v34 }
  0xe0   :  { %v517_v61 = vpop.f32.mrf.mxu0  ;;  %v334_v62 = vpop.f32.mrf.mxu1 }
  0xe1   :  { %v2902_v63 = vadd.f32 %v2336_v57, %v343_v60  ;;  %v335_v0 = vadd.f32 %v334_v62, %v170_v36 }
  0xe2   :  { %v2337_v1 = vpop.f32.mrf.mxu0  ;;  %v2319_v2 = vpop.f32.mrf.mxu1 }
  0xe3   :  { %v2904_v3 = vadd.f32 %v517_v61, %v335_v0  ;;  %v346_v4 = vadd.f32 %v2319_v2, %v2301_v38 }
  0xe4   :  { %v520_v5 = vpop.f32.mrf.mxu0  ;;  %v337_v6 = vpop.f32.mrf.mxu1 }
  0xe5   :  { %v2906_v7 = vadd.f32 %v2337_v1, %v346_v4  ;;  %v338_v8 = vadd.f32 %v337_v6, %v173_v40 }
  0xe6   :  { %v2340_v9 = vpop.f32.mrf.mxu0  ;;  %v2322_v10 = vpop.f32.mrf.mxu1 }
  0xe7   :  { %v2908_v11 = vadd.f32 %v520_v5, %v338_v8  ;;  %v359_v12 = vadd.f32 %v2322_v10, %v2304_v27 }
  0xe8   :  { %v533_v13 = vpop.f32.mrf.mxu0  ;;  %v350_v14 = vpop.f32.mrf.mxu1 }
  0xe9   :  { %v2910_v15 = vadd.f32 %v2340_v9, %v359_v12  ;;  %v351_v16 = vadd.f32 %v350_v14, %v186_v29 }
  0xea   :  { %v2341_v17 = vpop.f32.mrf.mxu0  ;;  %v2323_v18 = vpop.f32.mrf.mxu1 }
  0xeb   :  { %v2912_v19 = vadd.f32 %v533_v13, %v351_v16  ;;  %v362_v20 = vadd.f32 %v2323_v18, %v2305_v31 }
  0xec   :  { %v536_v21 = vpop.f32.mrf.mxu0  ;;  %v353_v22 = vpop.f32.mrf.mxu1 }
  0xed   :  { %v2914_v23 = vadd.f32 %v2341_v17, %v362_v20  ;;  %v354_v24 = vadd.f32 %v353_v22, %v189_v33 }
  0xee   :  { %v2344_v25 = vpop.f32.mrf.mxu0  ;;  %v2326_v26 = vpop.f32.mrf.mxu1 }
  0xef   :  { %v2916_v28 = vadd.f32 %v536_v21, %v354_v24  ;;  %v375_v27 = vadd.f32 %v2326_v26, %v2308_v35 }
  0xf0   :  { %v549_v30 = vpop.f32.mrf.mxu0  ;;  %v366_v32 = vpop.f32.mrf.mxu1 }
  0xf1   :  { %v2918_v34 = vadd.f32 %v2344_v25, %v375_v27  ;;  %v367_v29 = vadd.f32 %v366_v32, %v202_v37 }
  0xf2   :  { %v2345_v36 = vpop.f32.mrf.mxu0  ;;  %v2327_v38 = vpop.f32.mrf.mxu1 }
  0xf3   :  { %v2920_v40 = vadd.f32 %v549_v30, %v367_v29  ;;  %v378_v31 = vadd.f32 %v2327_v38, %v2309_v39 }
  0xf4   :  { %v552_v42 = vpop.f32.mrf.mxu0  ;;  %v369_v43 = vpop.f32.mrf.mxu1 }
  0xf5   :  { %v2922_v44 = vadd.f32 %v2345_v36, %v378_v31  ;;  %v370_v33 = vadd.f32 %v369_v43, %v2892_v41 }
  0xf6   :  { %v2368_v45 = vpop.f32.mrf.mxu0  ;;  %v2350_v46 = vpop.f32.mrf.mxu1 }
  0xf7   :  { %3170 = vst [vmem:[#allocation2_spill] sm:$0xff] %v2922_v44  ;;  %v2925_v48 = vadd.f32 %v552_v42, %v370_v33 }
  0xf8   :  { %v899_v35 = vpop.f32.mrf.mxu0  ;;  %v700_v49 = vpop.f32.mrf.mxu1 }
  0xf9   :  { %3171 = vst [vmem:[#allocation3_spill] sm:$0xff] %v2925_v48 }
  0xfa   :  { %v2927_v50 = vpop.f32.mrf.mxu0  ;;  %v2351_v37 = vpop.f32.mrf.mxu1 }
  0xfc   :  { %v2929_v52 = vpop.f32.mrf.mxu0  ;;  %v703_v53 = vpop.f32.mrf.mxu1 }
  0xfe   :  { %v2931_v54 = vpop.f32.mrf.mxu0  ;;  %v2933_v39 = vpop.f32.mrf.mxu1 }
 0x100   :  { %v2935_v56 = vpop.f32.mrf.mxu0  ;;  %v716_v57 = vpop.f32.mrf.mxu1 }
 0x102   :  { %v2937_v41 = vpop.f32.mrf.mxu0  ;;  %v2355_v58 = vpop.f32.mrf.mxu1 }
 0x104   :  { %v2939_v60 = vpop.f32.mrf.mxu0  ;;  %v719_v61 = vpop.f32.mrf.mxu1 }
 0x106   :  { %v2941_v62 = vpop.f32.mrf.mxu0  ;;  %v2943_v0 = vpop.f32.mrf.mxu1 }
 0x108   :  { %v2945_v1 = vpop.f32.mrf.mxu0  ;;  %v2947_v2 = vpop.f32.mrf.mxu1 }
 0x10a   :  { %v2949_v4 = vpop.f32.mrf.mxu0  ;;  %v2951_v5 = vpop.f32.mrf.mxu1 }
 0x10c   :  { %v2953_v6 = vpop.f32.mrf.mxu0  ;;  %v2955_v8 = vpop.f32.mrf.mxu1 }
 0x10d   :  { %3172 = vst [vmem:[#allocation4_spill] sm:$0xff] %v2953_v6 }
 0x10e   :  { %v2957_v9 = vpop.f32.mrf.mxu0  ;;  %v2959_v10 = vpop.f32.mrf.mxu1 }
 0x10f   :  { %3173 = vst [vmem:[#allocation5_spill] sm:$0xff] %v2957_v9 }
 0x110   :  { %v2961_v12 = vpop.f32.mrf.mxu0  ;;  %v2963_v13 = vpop.f32.mrf.mxu1 }
 0x111   :  { %3174 = vst [vmem:[#allocation6_spill] sm:$0xff] %v2961_v12  ;;  %v765_v12 = vadd.f32 %v2350_v46, %v2894_v47  ;;  %v764_v47 = vadd.f32 %v703_v53, %v2900_v59  ;;  %v768_v53 = vadd.f32 %v719_v61, %v2908_v11  ;;  %v774_v61 = vadd.f32 %v2951_v5, %v2914_v23 }
 0x112   :  { %v2965_v14 = vpop.f32.mrf.mxu0  ;;  %v2967_v16 = vpop.f32.mrf.mxu1 }
 0x113   :  { %3175 = vst [vmem:[#allocation7_spill] sm:$0xff] %v2965_v14  ;;  %3176 = vst [vmem:[#allocation8_spill] sm:$0xff] %v2967_v16  ;;  %v963_v59 = vadd.f32 %v2929_v52, %v764_v47 }
 0x114   :  { %v2969_v17 = vpop.f32.mrf.mxu0  ;;  %v2971_v18 = vpop.f32.mrf.mxu1 }
 0x115   :  { %3177 = vst [vmem:[#allocation9_spill] sm:$0xff] %v2969_v17  ;;  %3178 = vst [vmem:[#allocation10_spill] sm:$0xff] %v2971_v18 }
 0x116   :  { %v2404_v20 = vpop.f32.mrf.mxu0  ;;  %v2386_v21 = vpop.f32.mrf.mxu1 }
 0x118   :  { %v1297_v22 = vpop.f32.mrf.mxu0  ;;  %v1098_v24 = vpop.f32.mrf.mxu1 }
 0x11a   :  { %v2405_v25 = vpop.f32.mrf.mxu0  ;;  %v2387_v26 = vpop.f32.mrf.mxu1 }
 0x11c   :  { %v2973_v27 = vpop.f32.mrf.mxu0  ;;  %v1101_v30 = vpop.f32.mrf.mxu1 }
 0x11e   :  { %v2975_v32 = vpop.f32.mrf.mxu0  ;;  %v2390_v29 = vpop.f32.mrf.mxu1 }
 0x120   :  { %v2977_v36 = vpop.f32.mrf.mxu0  ;;  %v1114_v38 = vpop.f32.mrf.mxu1 }
 0x122   :  { %v2979_v31 = vpop.f32.mrf.mxu0  ;;  %v2981_v42 = vpop.f32.mrf.mxu1 }
 0x123   :  { %3179 = vst [vmem:[#allocation11_spill] sm:$0xff] %v2979_v31 }
 0x124   :  { %v2983_v43 = vpop.f32.mrf.mxu0  ;;  %v2985_v33 = vpop.f32.mrf.mxu1 }
 0x125   :  { %3180 = vst [vmem:[#allocation12_spill] sm:$0xff] %v2983_v43  ;;  %v763_v43 = vadd.f32 %v700_v49, %v2896_v51 }
 0x126   :  { %v2987_v17 = vpop.f32.mrf.mxu0  ;;  %v2989_v14 = vpop.f32.mrf.mxu1 }
 0x127   :  { %3181 = vst [vmem:[#allocation13_spill] sm:$0xff] %v2987_v17  ;;  %3182 = vst [vmem:[#allocation14_spill] sm:$0xff] %v2989_v14  ;;  %v964_v14 = vadd.f32 %v2368_v45, %v765_v12  ;;  %v767_v45 = vadd.f32 %v716_v57, %v2904_v3  ;;  %v1162_v3 = vadd.f32 %v1101_v30, %v963_v59 }
 0x128   :  { %v2991_v18 = vpop.f32.mrf.mxu0  ;;  %v2993_v48 = vpop.f32.mrf.mxu1 }
 0x129   :  { %3183 = vst [vmem:[#allocation15_spill] sm:$0xff] %v2991_v18  ;;  %3184 = vst [vmem:[#allocation16_spill] sm:$0xff] %v2993_v48  ;;  %v766_v18 = vadd.f32 %v2351_v37, %v2898_v55  ;;  %v1163_v46 = vadd.f32 %v2386_v21, %v964_v14  ;;  %v769_v55 = vadd.f32 %v2933_v39, %v2902_v63 }
 0x12a   :  { %v2995_v16 = vpop.f32.mrf.mxu0  ;;  %v2997_v44 = vpop.f32.mrf.mxu1  ;;  %v770_v37 = vadd.f32 %v2355_v58, %v2906_v7  ;;  %v966_v52 = vadd.f32 %v2935_v56, %v767_v45  ;;  %v1361_v23 = vadd.f32 %v2973_v27, %v1162_v3  ;;  %v3193_v3 = vld [vmem:[#allocation5_spill] sm:$0xff] }
 0x12b   :  { %3185 = vst [vmem:[#allocation17_spill] sm:$0xff] %v2995_v16  ;;  %3186 = vst [vmem:[#allocation18_spill] sm:$0xff] %v2997_v44  ;;  %v962_v44 = vadd.f32 %v899_v35, %v763_v43  ;;  %v965_v51 = vadd.f32 %v2927_v50, %v766_v18  ;;  %v1362_v12 = vadd.f32 %v2404_v20, %v1163_v46 }
 0x12c   :  { %v3000_v9 = vpop.f32.mrf.mxu0  ;;  %v3002_v31 = vpop.f32.mrf.mxu1  ;;  %v771_v50 = vadd.f32 %v2947_v2, %v2912_v19  ;;  %v968_v58 = vadd.f32 %v2931_v54, %v769_v55  ;;  %v969_v11 = vadd.f32 %v2937_v41, %v770_v37  ;;  %v775_v55 = vadd.f32 %v2963_v13, %v2920_v40 }
 0x12d   :  { %3187 = vst [vmem:[#allocation19_spill] sm:$0xff] %v3000_v9  ;;  %3188 = vst [vmem:[#allocation20_spill] sm:$0xff] %v3002_v31  ;;  %v1161_v49 = vadd.f32 %v1098_v24, %v962_v44  ;;  %v1164_v14 = vadd.f32 %v2387_v26, %v965_v51  ;;  %v773_v44 = vadd.f32 %v2943_v0, %v2910_v15  ;;  %v3042_v15 = vld [vmem:[%s3168_s2] ss:$0 sm:$0xff] }
 0x12e   :  { %v3005_v6 = vpop.f32.mrf.mxu0  ;;  %v3007_v17 = vpop.f32.mrf.mxu1  ;;  %v967_v0 = vadd.f32 %v2939_v60, %v768_v53  ;;  %v970_v56 = vadd.f32 %v2945_v1, %v771_v50  ;;  %v1167_v41 = vadd.f32 %v2390_v29, %v968_v58  ;;  %v1165_v24 = vadd.f32 %v1114_v38, %v966_v52  ;;  %v3190_v53 = vld [vmem:[#allocation4_spill] sm:$0xff] }
 0x12f   :  { %3189 = vst [vmem:[#allocation21_spill] sm:$0xff] %v3005_v6  ;;  %v1360_v39 = vadd.f32 %v1297_v22, %v1161_v49  ;;  %v1363_v2 = vadd.f32 %v2405_v25, %v1164_v14  ;;  %v972_v54 = vadd.f32 %v2941_v62, %v773_v44  ;;  %v973_v60 = vadd.f32 %v2949_v4, %v774_v61  ;;  %v3191_v14 = vld [vmem:[#allocation11_spill] sm:$0xff]  ;;  %v3192_v44 = vld [vmem:[#allocation14_spill] sm:$0xff]  ;;  %v3195_v52 = vld [vmem:[#allocation12_spill] sm:$0xff] }
 0x130   :  { %v3010_v48 = vpop.f32.mrf.mxu0  ;;  %v3012_v16 = vpop.f32.mrf.mxu1  ;;  %v772_v25 = vadd.f32 %v2955_v8, %v2916_v28  ;;  %v777_v62 = vadd.f32 %v2959_v10, %v2918_v34  ;;  %v1168_v1 = vadd.f32 %v2981_v42, %v969_v11  ;;  %v1366_v4 = vadd.f32 %v2975_v32, %v1167_v41 }
 0x131   :  { %v1364_v45 = vadd.f32 %v2977_v36, %v1165_v24  ;;  %v1166_v28 = vadd.f32 %v2985_v33, %v967_v0  ;;  %v1171_v50 = vadd.f32 %v3192_v44, %v972_v54  ;;  %v3196_v54 = vld [vmem:[#allocation13_spill] sm:$0xff]  ;;  %v3197_v24 = vld [vmem:[#allocation16_spill] sm:$0xff] }
 0x132   :  { %v3015_v9 = vpop.f32.mrf.mxu0  ;;  %v3017_v31 = vpop.f32.mrf.mxu1 }
 0x133   :  { %v1365_v11 = vadd.f32 %v3195_v52, %v1166_v28  ;;  %v1370_v41 = vadd.f32 %v3196_v54, %v1171_v50 }
 0x134   :  { %v3020_v6 = vpop.f32.mrf.mxu0  ;;  %v3026_v35 = vpop.f32.mrf.mxu1 }
 0x136   :  { %v2440_v21 = vpop.f32.mrf.mxu0  ;;  %v2422_v63 = vpop.f32.mrf.mxu1 }
 0x137   :  { %v1561_v57 = vadd.f32 %v2422_v63, %v1362_v12  ;;  %v971_v12 = vadd.f32 %v3190_v53, %v772_v25  ;;  %v3205_v53 = vld [vmem:[#allocation17_spill] sm:$0xff] }
 0x138   :  { %v1695_v7 = vpop.f32.mrf.mxu0  ;;  %v1496_v19 = vpop.f32.mrf.mxu1 }
 0x139   :  { %v1760_v18 = vadd.f32 %v2440_v21, %v1561_v57  ;;  %v1559_v20 = vadd.f32 %v1496_v19, %v1360_v39  ;;  %v1367_v21 = vadd.f32 %v3191_v14, %v1168_v1  ;;  %v976_v57 = vadd.f32 %v3193_v3, %v777_v62 }
 0x13a   :  { %v2441_v22 = vpop.f32.mrf.mxu0  ;;  %v2423_v26 = vpop.f32.mrf.mxu1 }
 0x13b   :  { %v1783_v5 = vadd.f32 %v3042_v15, %v1760_v18  ;;  %v1758_v30 = vadd.f32 %v1695_v7, %v1559_v20  ;;  %v1562_v43 = vadd.f32 %v2423_v26, %v1363_v2  ;;  %v3194_v7 = vld [vmem:[#allocation6_spill] sm:$0xff]  ;;  %v1169_v26 = vadd.f32 %v3197_v24, %v970_v56  ;;  %v3201_v56 = vld [vmem:[#allocation3_spill] sm:$0xff] }
 0x13c   :  { %v1698_v47 = vpop.f32.mrf.mxu0  ;;  %v1499_v29 = vpop.f32.mrf.mxu1  ;;  %v974_v58 = vadd.f32 %v3194_v7, %v775_v55 }
 0x13d   :  { %v1799_v38 = vmax.f32 %v1783_v5, 0.0  ;;  %v1781_v46 = vadd.f32 %v3042_v15, %v1758_v30  ;;  %v1761_v27 = vadd.f32 %v2441_v22, %v1562_v43  ;;  %v1560_v51 = vadd.f32 %v1499_v29, %v1361_v23  ;;  %v3198_v23 = vld [vmem:[#allocation18_spill] sm:$0xff] }
 0x13e   :  { %v2444_v49 = vpop.f32.mrf.mxu0  ;;  %v2426_v8 = vpop.f32.mrf.mxu1  ;;  %v1172_v5 = vadd.f32 %v3198_v23, %v973_v60 }
 0x13f   :  { %v2197_v34 = vpack.c.bf16 %v1799_v38, %v1799_v38  ;;  %v1797_v10 = vmax.f32 %v1781_v46, 0.0  ;;  %v1784_v42 = vadd.f32 %v3042_v15, %v1761_v27  ;;  %v1759_v37 = vadd.f32 %v1698_v47, %v1560_v51  ;;  %v3199_v38 = vld [vmem:[#allocation2_spill] sm:$0xff]  ;;  %v3200_v46 = vld [vmem:[#allocation8_spill] sm:$0xff] }
 0x140   :  { %v1711_v59 = vpop.f32.mrf.mxu0  ;;  %v1565_v40 = vadd.f32 %v2426_v8, %v1366_v4  ;;  %v1512_v13 = vpop.f32.mrf.mxu1  ;;  %v778_v27 = vadd.f32 %v3200_v46, %v3199_v38  ;;  %v3202_v51 = vld [vmem:[#allocation10_spill] sm:$0xff]  ;;  %v1371_v14 = vadd.f32 %v3205_v53, %v1172_v5 }
 0x141   :  { %1880 = vst.msk [vmem:[%s3169_s3 + $0x8] sm:$0xf] %vm1877_vm2, %v2197_v34  ;;  %v2195_v32 = vpack.c.bf16 %v1797_v10, %v1797_v10  ;;  %v1800_v36 = vmax.f32 %v1784_v42, 0.0  ;;  %v1782_v33 = vadd.f32 %v3042_v15, %v1759_v37  ;;  %v1563_v63 = vadd.f32 %v1512_v13, %v1364_v45  ;;  %v3204_v37 = vld [vmem:[#allocation15_spill] sm:$0xff] }
 0x142   :  { %v2445_v39 = vpop.f32.mrf.mxu0  ;;  %v1764_v61 = vadd.f32 %v2444_v49, %v1565_v40  ;;  %v2427_v19 = vpop.f32.mrf.mxu1  ;;  %v776_v60 = vadd.f32 %v3202_v51, %v3201_v56  ;;  %v3203_v49 = vld [vmem:[#allocation20_spill] sm:$0xff] }
 0x143   :  { %1878 = vst.msk [vmem:[%s3169_s3] sm:$0xf] %vm1877_vm2, %v2195_v32  ;;  %v2198_v0 = vpack.c.bf16 %v1800_v36, %v1800_v36  ;;  %v1798_v2 = vmax.f32 %v1782_v33, 0.0  ;;  %v1762_v18 = vadd.f32 %v1711_v59, %v1563_v63  ;;  %v1566_v20 = vadd.f32 %v2427_v19, %v1367_v21  ;;  %v3206_v33 = vld [vmem:[#allocation19_spill] sm:$0xff] }
 0x144   :  { %v1714_v22 = vpop.f32.mrf.mxu0  ;;  %v1787_v30 = vadd.f32 %v3042_v15, %v1764_v61  ;;  %v1515_v43 = vpop.f32.mrf.mxu1  ;;  %v1170_v55 = vadd.f32 %v3203_v49, %v971_v12  ;;  %v1368_v59 = vadd.f32 %v3204_v37, %v1169_v26  ;;  %v1175_v21 = vadd.f32 %v3007_v17, %v976_v57  ;;  %v3207_v19 = vld [vmem:[#allocation7_spill] sm:$0xff] }
 0x145   :  { %1881 = vst.msk [vmem:[%s3169_s3 + $0xc] sm:$0xf] %vm1877_vm2, %v2198_v0  ;;  %v2196_v47 = vpack.c.bf16 %v1798_v2, %v1798_v2  ;;  %v1785_v25 = vadd.f32 %v3042_v15, %v1762_v18  ;;  %v1765_v62 = vadd.f32 %v2445_v39, %v1566_v20  ;;  %v1564_v1 = vadd.f32 %v1515_v43, %v1365_v11  ;;  %v3209_v2 = vld [vmem:[#allocation21_spill] sm:$0xff] }
 0x146   :  { %v2448_v29 = vpop.f32.mrf.mxu0  ;;  %v1803_v4 = vmax.f32 %v1787_v30, 0.0  ;;  %v2430_v45 = vpop.f32.mrf.mxu1  ;;  %v1369_v63 = vadd.f32 %v3206_v33, %v1170_v55  ;;  %v1173_v39 = vadd.f32 %v3012_v16, %v974_v58  ;;  %v977_v16 = vadd.f32 %v3207_v19, %v778_v27  ;;  %v3208_v58 = vld [vmem:[#allocation9_spill] sm:$0xff] }
 0x147   :  { %1879 = vst.msk [vmem:[%s3169_s3 + $0x4] sm:$0xf] %vm1877_vm2, %v2196_v47  ;;  %v1801_v28 = vmax.f32 %v1785_v25, 0.0  ;;  %v1788_v8 = vadd.f32 %v3042_v15, %v1765_v62  ;;  %v1763_v34 = vadd.f32 %v1714_v22, %v1564_v1  ;;  %v1569_v10 = vadd.f32 %v2430_v45, %v1370_v41 }
 0x148   :  { %v1727_v42 = vpop.f32.mrf.mxu0  ;;  %v2201_v12 = vpack.c.bf16 %v1803_v4, %v1803_v4  ;;  %v1528_v44 = vpop.f32.mrf.mxu1  ;;  %v975_v0 = vadd.f32 %v3208_v58, %v776_v60  ;;  %v1374_v18 = vadd.f32 %v3209_v2, %v1175_v21  ;;  %v1372_v5 = vadd.f32 %v3010_v48, %v1173_v39 }
 0x149   :  { %v2199_v50 = vpack.c.bf16 %v1801_v28, %v1801_v28  ;;  %v1804_v40 = vmax.f32 %v1788_v8, 0.0  ;;  %v1786_v13 = vadd.f32 %v3042_v15, %v1763_v34  ;;  %v1768_v32 = vadd.f32 %v2448_v29, %v1569_v10 }
 0x14a   :  { %v2449_v36 = vpop.f32.mrf.mxu0  ;;  %1884 = vst.msk [vmem:[%s3169_s3 + $0x18] sm:$0xf] %vm1877_vm2, %v2201_v12  ;;  %v1567_v3 = vadd.f32 %v1528_v44, %v1368_v59  ;;  %v2431_v7 = vpop.f32.mrf.mxu1  ;;  %v1176_v30 = vadd.f32 %v3017_v31, %v977_v16  ;;  %v1174_v43 = vadd.f32 %v3026_v35, %v975_v0 }
 0x14b   :  { %1882 = vst.msk [vmem:[%s3169_s3 + $0x10] sm:$0xf] %vm1877_vm2, %v2199_v50  ;;  %v2202_v17 = vpack.c.bf16 %v1804_v40, %v1804_v40  ;;  %v1802_v57 = vmax.f32 %v1786_v13, 0.0  ;;  %v1791_v52 = vadd.f32 %v3042_v15, %v1768_v32  ;;  %v1570_v11 = vadd.f32 %v2431_v7, %v1371_v14 }
 0x14c   :  { %v1730_v61 = vpop.f32.mrf.mxu0  ;;  %v1766_v20 = vadd.f32 %v1727_v42, %v1567_v3  ;;  %v1531_v22 = vpop.f32.mrf.mxu1  ;;  %v1375_v60 = vadd.f32 %v3015_v9, %v1176_v30  ;;  %v1373_v49 = vadd.f32 %v3020_v6, %v1174_v43 }
 0x14d   :  { %1885 = vst.msk [vmem:[%s3169_s3 + $0x1c] sm:$0xf] %vm1877_vm2, %v2202_v17  ;;  %v2200_v54 = vpack.c.bf16 %v1802_v57, %v1802_v57  ;;  %v1807_v41 = vmax.f32 %v1791_v52, 0.0  ;;  %v1769_v24 = vadd.f32 %v2449_v36, %v1570_v11  ;;  %v1568_v26 = vadd.f32 %v1531_v22, %v1369_v63 }
 0x14e   :  { %v2452_v23 = vpop.f32.mrf.mxu0  ;;  %v1789_v47 = vadd.f32 %v3042_v15, %v1766_v20  ;;  %v2434_v25 = vpop.f32.mrf.mxu1 }
 0x14f   :  { %1883 = vst.msk [vmem:[%s3169_s3 + $0x14] sm:$0xf] %vm1877_vm2, %v2200_v54  ;;  %v2205_v62 = vpack.c.bf16 %v1807_v41, %v1807_v41  ;;  %v1792_v1 = vadd.f32 %v3042_v15, %v1769_v24  ;;  %v1767_v29 = vadd.f32 %v1730_v61, %v1568_v26  ;;  %v1573_v38 = vadd.f32 %v2434_v25, %v1374_v18 }
 0x150   :  { %v1743_v46 = vpop.f32.mrf.mxu0  ;;  %v1805_v27 = vmax.f32 %v1789_v47, 0.0  ;;  %v1544_v48 = vpop.f32.mrf.mxu1 }
 0x151   :  { %1888 = vst.msk [vmem:[%s3169_s3 + $0x28] sm:$0xf] %vm1877_vm2, %v2205_v62  ;;  %v1808_v31 = vmax.f32 %v1792_v1, 0.0  ;;  %v1790_v35 = vadd.f32 %v3042_v15, %v1767_v29  ;;  %v1772_v56 = vadd.f32 %v2452_v23, %v1573_v38  ;;  %v1571_v51 = vadd.f32 %v1544_v48, %v1372_v5 }
 0x152   :  { %v2203_v55 = vpack.c.bf16 %v1805_v27, %v1805_v27  ;;  %v2435_v4 = vpop.f32.mrf.mxu1  ;;  %v2453_v45 = vpop.f32.mrf.mxu0 }
 0x153   :  { %v2206_v28 = vpack.c.bf16 %v1808_v31, %v1808_v31  ;;  %v1806_v8 = vmax.f32 %v1790_v35, 0.0  ;;  %v1795_v34 = vadd.f32 %v3042_v15, %v1772_v56  ;;  %v1770_v10 = vadd.f32 %v1743_v46, %v1571_v51 }
 0x154   :  { %1886 = vst.msk [vmem:[%s3169_s3 + $0x20] sm:$0xf] %vm1877_vm2, %v2203_v55  ;;  %v1574_v42 = vadd.f32 %v2435_v4, %v1375_v60  ;;  %v1547_v37 = vpop.f32.mrf.mxu1  ;;  %v1746_v21 = vpop.f32.mrf.mxu0 }
 0x155   :  { %1889 = vst.msk [vmem:[%s3169_s3 + $0x2c] sm:$0xf] %vm1877_vm2, %v2206_v28  ;;  %v2204_v6 = vpack.c.bf16 %v1806_v8, %v1806_v8  ;;  %v1811_v9 = vmax.f32 %v1795_v34, 0.0  ;;  %v1793_v59 = vadd.f32 %v3042_v15, %v1770_v10  ;;  %v1572_v53 = vadd.f32 %v1547_v37, %v1373_v49 }
 0x156   :  { %v1773_v14 = vadd.f32 %v2453_v45, %v1574_v42 }
 0x157   :  { %1887 = vst.msk [vmem:[%s3169_s3 + $0x24] sm:$0xf] %vm1877_vm2, %v2204_v6  ;;  %v2209_v12 = vpack.c.bf16 %v1811_v9, %v1811_v9  ;;  %v1809_v44 = vmax.f32 %v1793_v59, 0.0  ;;  %v1771_v50 = vadd.f32 %v1746_v21, %v1572_v53 }
 0x158   :  { %v1796_v40 = vadd.f32 %v3042_v15, %v1773_v14 }
 0x159   :  { %1892 = vst.msk [vmem:[%s3169_s3 + $0x38] sm:$0xf] %vm1877_vm2, %v2209_v12  ;;  %v2207_v13 = vpack.c.bf16 %v1809_v44, %v1809_v44  ;;  %v1794_v32 = vadd.f32 %v3042_v15, %v1771_v50 }
 0x15a   :  { %v1812_v36 = vmax.f32 %v1796_v40, 0.0 }
 0x15b   :  { %1890 = vst.msk [vmem:[%s3169_s3 + $0x30] sm:$0xf] %vm1877_vm2, %v2207_v13  ;;  %v1810_v33 = vmax.f32 %v1794_v32, 0.0 }
 0x15c   :  { %v2210_v63 = vpack.c.bf16 %v1812_v36, %v1812_v36 }
 0x15d   :  { %v2208_v39 = vpack.c.bf16 %v1810_v33, %v1810_v33 }
 0x15e   :  { %1893 = vst.msk [vmem:[%s3169_s3 + $0x3c] sm:$0xf] %vm1877_vm2, %v2210_v63 }
 0x15f   :  { %1891 = vst.msk [vmem:[%s3169_s3 + $0x34] sm:$0xf] %vm1877_vm2, %v2208_v39 }

// kernel: discriminator_forward.6
= control target key start
LH: loop header
LB: loop body
LE: loop exit
PB: predicated region body
PF: predicated region fallthrough
CT: control target
= control target key end

     0   :  { %vm95_vm0 = vcmask 785408   ;;  %vm1144_vm1 = vcmask 519168   ;;  %s1937_s1 = inlined_call_operand.vmem [shape: bf16[9,96,64], index: 1, kind: input, shape index: {}]   ;;  %s1938_s0 = inlined_call_operand.vmem [shape: bf16[9,32,96], index: 0, kind: input, shape index: {}]   ;;  %s1939_s2 = inlined_call_operand.vmem [shape: f32[1,64], index: 2, kind: input, shape index: {}]   ;;  %s1940_s3 = inlined_call_operand.vmem [shape: bf16[32,64], index: 3, kind: output, shape index: {}]  }
   0x1   :  { %v1596_v0 = vld [vmem:[%s1937_s1 + $0x58] sm:$0xff]   ;;  %v1597_v1 = vld [vmem:[%s1937_s1 + $0x28] sm:$0xff]   ;;  %v1598_v2 = vld [vmem:[%s1937_s1 + $0x50] sm:$0xff]  }
   0x2   :  { %1452 = vmatprep.subr.bf16.mxu0 %v1596_v0  ;;  %1468 = vmatprep.subr.bf16.mxu1 %v1597_v1  ;;  %v1599_v3 = vld [vmem:[%s1937_s1 + $0x20] sm:$0xff]   ;;  %v1600_v4 = vld [vmem:[%s1937_s1 + $0x48] sm:$0xff]   ;;  %v1601_v5 = vld [vmem:[%s1937_s1 + $0x18] sm:$0xff]  }
   0x3   :  { %1453 = vmatpush3.bf16.msra.mxu0 %v1596_v0  ;;  %1469 = vmatpush3.bf16.msra.mxu1 %v1597_v1  ;;  %v1602_v6 = vld [vmem:[%s1937_s1 + $0x40] sm:$0xff]   ;;  %v1603_v7 = vld [vmem:[%s1937_s1 + $0x10] sm:$0xff]   ;;  %v1604_v8 = vld [vmem:[%s1937_s1 + $0x38] sm:$0xff]  }
   0x4   :  { %1454 = vmatprep.subr.bf16.mxu0 %v1598_v2  ;;  %1470 = vmatprep.subr.bf16.mxu1 %v1599_v3  ;;  %v1605_v9 = vld [vmem:[%s1937_s1 + $0x8] sm:$0xff]   ;;  %v1608_v10 = vld [vmem:[%s1938_s0 + $0x10] sm:$0xff]   ;;  %v1609_v11 = vld [vmem:[%s1938_s0] sm:$0xff]  }
   0x5   :  { %1464 = vmatprep.mubr.msk.bf16.mxu0 %vm95_vm0, %v1608_v10  ;;  %1480 = vmatprep.mubr.msk.bf16.mxu1 %vm95_vm0, %v1609_v11  ;;  %v1606_v12 = vld [vmem:[%s1937_s1 + $0x30] sm:$0xff]   ;;  %v1607_v13 = vld [vmem:[%s1937_s1] sm:$0xff]   ;;  %v1612_v14 = vld [vmem:[%s1937_s1 + $0x88] sm:$0xff]  }
   0x6   :  { %v1613_v15 = vld [vmem:[%s1937_s1 + $0xb8] sm:$0xff]   ;;  %v1611_v17 = vld [vmem:[%s1938_s0 + $0x8] sm:$0xff]   ;;  %v1614_v18 = vld [vmem:[%s1937_s1 + $0x80] sm:$0xff]  }
   0x7   :  { %1455 = vmatpush3.bf16.msra.mxu0 %v1598_v2  ;;  %1471 = vmatpush3.bf16.msra.mxu1 %v1599_v3  ;;  %v1610_v16 = vld [vmem:[%s1938_s0 + $0x18] sm:$0xff]   ;;  %v1615_v19 = vld [vmem:[%s1937_s1 + $0xb0] sm:$0xff]   ;;  %v1624_v21 = vld [vmem:[%s1938_s0 + $0x20] sm:$0xff]  }
   0x8   :  { %1456 = vmatprep.subr.bf16.mxu0 %v1600_v4  ;;  %1472 = vmatprep.subr.bf16.mxu1 %v1601_v5  ;;  %v1616_v20 = vld [vmem:[%s1937_s1 + $0x78] sm:$0xff]   ;;  %v1617_v22 = vld [vmem:[%s1937_s1 + $0xa8] sm:$0xff]   ;;  %v1627_v23 = vld [vmem:[%s1938_s0 + $0x30] sm:$0xff]  }
   0x9   :  { %v1618_v24 = vld [vmem:[%s1937_s1 + $0x70] sm:$0xff]   ;;  %v1619_v25 = vld [vmem:[%s1937_s1 + $0xa0] sm:$0xff]   ;;  %v1620_v26 = vld [vmem:[%s1937_s1 + $0x68] sm:$0xff]  }
   0xa   :  { %v1621_v27 = vld [vmem:[%s1937_s1 + $0x98] sm:$0xff]   ;;  %v1622_v28 = vld [vmem:[%s1937_s1 + $0x60] sm:$0xff]   ;;  %v1623_v29 = vld [vmem:[%s1937_s1 + $0x90] sm:$0xff]  }
   0xb   :  { %1457 = vmatpush3.bf16.msra.mxu0 %v1600_v4  ;;  %1473 = vmatpush3.bf16.msra.mxu1 %v1601_v5  ;;  %v1625_v30 = vld [vmem:[%s1938_s0 + $0x28] sm:$0xff]   ;;  %v1629_v32 = vld [vmem:[%s1937_s1 + $0x118] sm:$0xff]   ;;  %v1630_v34 = vld [vmem:[%s1937_s1 + $0xe0] sm:$0xff]  }
   0xc   :  { %1458 = vmatprep.subr.bf16.mxu0 %v1602_v6  ;;  %1474 = vmatprep.subr.bf16.mxu1 %v1603_v7  ;;  %v1626_v31 = vld [vmem:[%s1937_s1 + $0xe8] sm:$0xff]   ;;  %v1628_v33 = vld [vmem:[%s1938_s0 + $0x38] sm:$0xff]   ;;  %v1631_v35 = vld [vmem:[%s1937_s1 + $0x110] sm:$0xff]  }
   0xd   :  { %v1640_v36 = vld [vmem:[%s1938_s0 + $0x40] sm:$0xff]   ;;  %v1643_v37 = vld [vmem:[%s1938_s0 + $0x50] sm:$0xff]   ;;  %v1632_v38 = vld [vmem:[%s1937_s1 + $0xd8] sm:$0xff]  }
   0xe   :  { %v1633_v39 = vld [vmem:[%s1937_s1 + $0x108] sm:$0xff]   ;;  %v1634_v40 = vld [vmem:[%s1937_s1 + $0xd0] sm:$0xff]   ;;  %v1635_v41 = vld [vmem:[%s1937_s1 + $0x100] sm:$0xff]  }
   0xf   :  { %1459 = vmatpush3.bf16.msra.mxu0 %v1602_v6  ;;  %1475 = vmatpush3.bf16.msra.mxu1 %v1603_v7  ;;  %v1636_v42 = vld [vmem:[%s1937_s1 + $0xc8] sm:$0xff]   ;;  %v1637_v43 = vld [vmem:[%s1937_s1 + $0xf8] sm:$0xff]   ;;  %v1638_v44 = vld [vmem:[%s1937_s1 + $0xc0] sm:$0xff]  }
  0x10   :  { %1460 = vmatprep.subr.bf16.mxu0 %v1604_v8  ;;  %1476 = vmatprep.subr.bf16.mxu1 %v1605_v9  ;;  %v1639_v45 = vld [vmem:[%s1937_s1 + $0xf0] sm:$0xff]   ;;  %v1642_v46 = vld [vmem:[%s1937_s1 + $0x148] sm:$0xff]   ;;  %v1645_v47 = vld [vmem:[%s1937_s1 + $0x178] sm:$0xff]  }
  0x11   :  { %v1641_v48 = vld [vmem:[%s1938_s0 + $0x48] sm:$0xff]   ;;  %v1644_v49 = vld [vmem:[%s1938_s0 + $0x58] sm:$0xff]   ;;  %v1646_v50 = vld [vmem:[%s1937_s1 + $0x140] sm:$0xff]  }
  0x12   :  { %v1647_v51 = vld [vmem:[%s1937_s1 + $0x170] sm:$0xff]   ;;  %v1656_v52 = vld [vmem:[%s1938_s0 + $0x60] sm:$0xff]   ;;  %v1648_v54 = vld [vmem:[%s1937_s1 + $0x138] sm:$0xff]  }
  0x13   :  { %1461 = vmatpush3.bf16.msra.mxu0 %v1604_v8  ;;  %1477 = vmatpush3.bf16.msra.mxu1 %v1605_v9  ;;  %v1659_v53 = vld [vmem:[%s1938_s0 + $0x70] sm:$0xff]   ;;  %v1649_v55 = vld [vmem:[%s1937_s1 + $0x168] sm:$0xff]   ;;  %v1651_v57 = vld [vmem:[%s1937_s1 + $0x160] sm:$0xff]  }
  0x14   :  { %1462 = vmatprep.subr.bf16.mxu0 %v1606_v12  ;;  %1478 = vmatprep.subr.bf16.mxu1 %v1607_v13  ;;  %v1650_v56 = vld [vmem:[%s1937_s1 + $0x130] sm:$0xff]   ;;  %v1652_v58 = vld [vmem:[%s1937_s1 + $0x128] sm:$0xff]   ;;  %v1653_v59 = vld [vmem:[%s1937_s1 + $0x158] sm:$0xff]  }
  0x15   :  { %v1654_v60 = vld [vmem:[%s1937_s1 + $0x120] sm:$0xff]   ;;  %v1655_v61 = vld [vmem:[%s1937_s1 + $0x150] sm:$0xff]   ;;  %v1658_v62 = vld [vmem:[%s1937_s1 + $0x1a8] sm:$0xff]  }
  0x16   :  { %v1657_v63 = vld [vmem:[%s1938_s0 + $0x68] sm:$0xff]   ;;  %v1660_v0 = vld [vmem:[%s1938_s0 + $0x78] sm:$0xff]   ;;  %v1661_v1 = vld [vmem:[%s1937_s1 + $0x1a0] sm:$0xff]  }
  0x17   :  { %1463 = vmatpush3.bf16.msra.mxu0 %v1606_v12  ;;  %1479 = vmatpush3.bf16.msra.mxu1 %v1607_v13  ;;  %v1666_v2 = vld [vmem:[%s1938_s0 + $0x80] sm:$0xff]   ;;  %v1662_v3 = vld [vmem:[%s1937_s1 + $0x198] sm:$0xff]   ;;  %v1663_v4 = vld [vmem:[%s1937_s1 + $0x190] sm:$0xff]  }
  0x18   :  { %1484 = vmatprep.subr.bf16.mxu0 %v1612_v14  ;;  %1500 = vmatprep.subr.bf16.mxu1 %v1613_v15  ;;  %v1664_v5 = vld [vmem:[%s1937_s1 + $0x188] sm:$0xff]   ;;  %v1665_v6 = vld [vmem:[%s1937_s1 + $0x180] sm:$0xff]  }
  0x19   :  { %v1667_v7 = vld [vmem:[%s1938_s0 + $0x88] sm:$0xff]  }
  0x1a   :  { %1465 = vmatmul.mubr.msk.bf16.vlgmr.msra.gmra.mxu0 %vm95_vm0, %v1610_v16  ;;  %1481 = vmatmul.mubr.msk.bf16.vlgmr.msra.gmra.mxu1 %vm95_vm0, %v1611_v17 }
  0x1b   :  { %1485 = vmatpush3.bf16.msra.mxu0 %v1612_v14  ;;  %1501 = vmatpush3.bf16.msra.mxu1 %v1613_v15 }
  0x1c   :  { %1486 = vmatprep.subr.bf16.mxu0 %v1614_v18  ;;  %1502 = vmatprep.subr.bf16.mxu1 %v1615_v19 }
  0x1d   :  { %1496 = vmatprep.mubr.msk.bf16.mxu0 %vm95_vm0, %v1624_v21  ;;  %1512 = vmatprep.mubr.msk.bf16.mxu1 %vm95_vm0, %v1627_v23 }
  0x1f   :  { %1487 = vmatpush3.bf16.msra.mxu0 %v1614_v18  ;;  %1503 = vmatpush3.bf16.msra.mxu1 %v1615_v19 }
  0x20   :  { %1488 = vmatprep.subr.bf16.mxu0 %v1616_v20  ;;  %1504 = vmatprep.subr.bf16.mxu1 %v1617_v22 }
  0x23   :  { %1489 = vmatpush3.bf16.msra.mxu0 %v1616_v20  ;;  %1505 = vmatpush3.bf16.msra.mxu1 %v1617_v22 }
  0x24   :  { %1490 = vmatprep.subr.bf16.mxu0 %v1618_v24  ;;  %1506 = vmatprep.subr.bf16.mxu1 %v1619_v25 }
  0x27   :  { %1491 = vmatpush3.bf16.msra.mxu0 %v1618_v24  ;;  %1507 = vmatpush3.bf16.msra.mxu1 %v1619_v25 }
  0x28   :  { %1492 = vmatprep.subr.bf16.mxu0 %v1620_v26  ;;  %1508 = vmatprep.subr.bf16.mxu1 %v1621_v27 }
  0x2b   :  { %1493 = vmatpush3.bf16.msra.mxu0 %v1620_v26  ;;  %1509 = vmatpush3.bf16.msra.mxu1 %v1621_v27 }
  0x2c   :  { %1494 = vmatprep.subr.bf16.mxu0 %v1622_v28  ;;  %1510 = vmatprep.subr.bf16.mxu1 %v1623_v29 }
  0x2f   :  { %1495 = vmatpush3.bf16.msra.mxu0 %v1622_v28  ;;  %1511 = vmatpush3.bf16.msra.mxu1 %v1623_v29 }
  0x30   :  { %1516 = vmatprep.subr.bf16.mxu0 %v1626_v31  ;;  %1532 = vmatprep.subr.bf16.mxu1 %v1629_v32 }
  0x32   :  { %1497 = vmatmul.mubr.msk.bf16.vlgmr.msra.gmra.mxu0 %vm95_vm0, %v1625_v30  ;;  %1513 = vmatmul.mubr.msk.bf16.vlgmr.msra.gmra.mxu1 %vm95_vm0, %v1628_v33 }
  0x33   :  { %1517 = vmatpush3.bf16.msra.mxu0 %v1626_v31  ;;  %1533 = vmatpush3.bf16.msra.mxu1 %v1629_v32 }
  0x34   :  { %1518 = vmatprep.subr.bf16.mxu0 %v1630_v34  ;;  %1534 = vmatprep.subr.bf16.mxu1 %v1631_v35 }
  0x35   :  { %1528 = vmatprep.mubr.msk.bf16.mxu0 %vm95_vm0, %v1640_v36  ;;  %1544 = vmatprep.mubr.msk.bf16.mxu1 %vm95_vm0, %v1643_v37 }
  0x37   :  { %1519 = vmatpush3.bf16.msra.mxu0 %v1630_v34  ;;  %1535 = vmatpush3.bf16.msra.mxu1 %v1631_v35 }
  0x38   :  { %1520 = vmatprep.subr.bf16.mxu0 %v1632_v38  ;;  %1536 = vmatprep.subr.bf16.mxu1 %v1633_v39 }
  0x3b   :  { %1521 = vmatpush3.bf16.msra.mxu0 %v1632_v38  ;;  %1537 = vmatpush3.bf16.msra.mxu1 %v1633_v39 }
  0x3c   :  { %1522 = vmatprep.subr.bf16.mxu0 %v1634_v40  ;;  %1538 = vmatprep.subr.bf16.mxu1 %v1635_v41 }
  0x3f   :  { %1523 = vmatpush3.bf16.msra.mxu0 %v1634_v40  ;;  %1539 = vmatpush3.bf16.msra.mxu1 %v1635_v41 }
  0x40   :  { %1524 = vmatprep.subr.bf16.mxu0 %v1636_v42  ;;  %1540 = vmatprep.subr.bf16.mxu1 %v1637_v43 }
  0x43   :  { %1525 = vmatpush3.bf16.msra.mxu0 %v1636_v42  ;;  %1541 = vmatpush3.bf16.msra.mxu1 %v1637_v43 }
  0x44   :  { %1526 = vmatprep.subr.bf16.mxu0 %v1638_v44  ;;  %1542 = vmatprep.subr.bf16.mxu1 %v1639_v45 }
  0x47   :  { %1527 = vmatpush3.bf16.msra.mxu0 %v1638_v44  ;;  %1543 = vmatpush3.bf16.msra.mxu1 %v1639_v45 }
  0x48   :  { %1548 = vmatprep.subr.bf16.mxu0 %v1642_v46  ;;  %1564 = vmatprep.subr.bf16.mxu1 %v1645_v47 }
  0x4a   :  { %1529 = vmatmul.mubr.msk.bf16.vlgmr.msra.gmra.mxu0 %vm95_vm0, %v1641_v48  ;;  %1545 = vmatmul.mubr.msk.bf16.vlgmr.msra.gmra.mxu1 %vm95_vm0, %v1644_v49 }
  0x4b   :  { %1549 = vmatpush3.bf16.msra.mxu0 %v1642_v46  ;;  %1565 = vmatpush3.bf16.msra.mxu1 %v1645_v47 }
  0x4c   :  { %1550 = vmatprep.subr.bf16.mxu0 %v1646_v50  ;;  %1566 = vmatprep.subr.bf16.mxu1 %v1647_v51 }
  0x4d   :  { %1560 = vmatprep.mubr.msk.bf16.mxu0 %vm95_vm0, %v1656_v52  ;;  %1576 = vmatprep.mubr.msk.bf16.mxu1 %vm95_vm0, %v1659_v53 }
  0x4f   :  { %1551 = vmatpush3.bf16.msra.mxu0 %v1646_v50  ;;  %1567 = vmatpush3.bf16.msra.mxu1 %v1647_v51 }
  0x50   :  { %1552 = vmatprep.subr.bf16.mxu0 %v1648_v54  ;;  %1568 = vmatprep.subr.bf16.mxu1 %v1649_v55 }
  0x53   :  { %1553 = vmatpush3.bf16.msra.mxu0 %v1648_v54  ;;  %1569 = vmatpush3.bf16.msra.mxu1 %v1649_v55 }
  0x54   :  { %1554 = vmatprep.subr.bf16.mxu0 %v1650_v56  ;;  %1570 = vmatprep.subr.bf16.mxu1 %v1651_v57 }
  0x57   :  { %1555 = vmatpush3.bf16.msra.mxu0 %v1650_v56  ;;  %1571 = vmatpush3.bf16.msra.mxu1 %v1651_v57 }
  0x58   :  { %1556 = vmatprep.subr.bf16.mxu0 %v1652_v58  ;;  %1572 = vmatprep.subr.bf16.mxu1 %v1653_v59 }
  0x5b   :  { %1557 = vmatpush3.bf16.msra.mxu0 %v1652_v58  ;;  %1573 = vmatpush3.bf16.msra.mxu1 %v1653_v59 }
  0x5c   :  { %1558 = vmatprep.subr.bf16.mxu0 %v1654_v60  ;;  %1574 = vmatprep.subr.bf16.mxu1 %v1655_v61 }
  0x5f   :  { %1559 = vmatpush3.bf16.msra.mxu0 %v1654_v60  ;;  %1575 = vmatpush3.bf16.msra.mxu1 %v1655_v61 }
  0x60   :  { %1580 = vmatprep.subr.bf16.mxu0 %v1658_v62 }
  0x62   :  { %1561 = vmatmul.mubr.msk.bf16.vlgmr.msra.gmra.mxu0 %vm95_vm0, %v1657_v63  ;;  %1577 = vmatmul.mubr.msk.bf16.vlgmr.msra.gmra.mxu1 %vm95_vm0, %v1660_v0  ;;  %v1371_v0 = vld [vmem:[%s1939_s2] ss:$0 sm:$0xff] }
  0x63   :  { %1581 = vmatpush3.bf16.msra.mxu0 %v1658_v62  ;;  %1592 = vmatprep.mubr.msk.bf16.mxu0 %vm95_vm0, %v1666_v2 }
  0x64   :  { %1582 = vmatprep.subr.bf16.mxu0 %v1661_v1 }
  0x67   :  { %1583 = vmatpush3.bf16.msra.mxu0 %v1661_v1 }
  0x68   :  { %1584 = vmatprep.subr.bf16.mxu0 %v1662_v3 }
  0x6b   :  { %1585 = vmatpush3.bf16.msra.mxu0 %v1662_v3 }
  0x6c   :  { %1586 = vmatprep.subr.bf16.mxu0 %v1663_v4 }
  0x6f   :  { %1587 = vmatpush3.bf16.msra.mxu0 %v1663_v4 }
  0x70   :  { %1588 = vmatprep.subr.bf16.mxu0 %v1664_v5 }
  0x73   :  { %1589 = vmatpush3.bf16.msra.mxu0 %v1664_v5 }
  0x74   :  { %1590 = vmatprep.subr.bf16.mxu0 %v1665_v6 }
  0x77   :  { %1591 = vmatpush3.bf16.msra.mxu0 %v1665_v6 }
  0x7a   :  { %1593 = vmatmul.mubr.msk.bf16.vlgmr.msra.gmra.mxu0 %vm95_vm0, %v1667_v7 }
  0xda   :  { %v1466_v8 = vpop.f32.mrf.mxu0  ;;  %v1482_v9 = vpop.f32.mrf.mxu1 }
  0xdb   :  { %v246_v29 = vadd.f32 %v1482_v9, %v1466_v8 }
  0xdc   :  { %v136_v10 = vpop.f32.mrf.mxu0  ;;  %v237_v11 = vpop.f32.mrf.mxu1 }
  0xdd   :  { %v238_v30 = vadd.f32 %v237_v11, %v136_v10 }
  0xde   :  { %v1467_v12 = vpop.f32.mrf.mxu0  ;;  %v1483_v13 = vpop.f32.mrf.mxu1 }
  0xdf   :  { %v249_v34 = vadd.f32 %v1483_v13, %v1467_v12 }
  0xe0   :  { %v139_v14 = vpop.f32.mrf.mxu0  ;;  %v240_v16 = vpop.f32.mrf.mxu1 }
  0xe1   :  { %v241_v37 = vadd.f32 %v240_v16, %v139_v14 }
  0xf2   :  { %v1498_v15 = vpop.f32.mrf.mxu0  ;;  %v1514_v18 = vpop.f32.mrf.mxu1 }
  0xf3   :  { %v373_v31 = vadd.f32 %v1498_v15, %v246_v29 }
  0xf4   :  { %v356_v17 = vpop.f32.mrf.mxu0  ;;  %v479_v20 = vpop.f32.mrf.mxu1 }
  0xf5   :  { %v371_v35 = vadd.f32 %v356_v17, %v238_v30  ;;  %v496_v38 = vadd.f32 %v1514_v18, %v373_v31 }
  0xf6   :  { %v1499_v19 = vpop.f32.mrf.mxu0  ;;  %v1515_v22 = vpop.f32.mrf.mxu1 }
  0xf7   :  { %v374_v39 = vadd.f32 %v1499_v19, %v249_v34  ;;  %v494_v41 = vadd.f32 %v479_v20, %v371_v35 }
  0xf8   :  { %v359_v21 = vpop.f32.mrf.mxu0  ;;  %v482_v24 = vpop.f32.mrf.mxu1 }
  0xf9   :  { %v372_v42 = vadd.f32 %v359_v21, %v241_v37  ;;  %v497_v46 = vadd.f32 %v1515_v22, %v374_v39 }
  0xfb   :  { %v495_v48 = vadd.f32 %v482_v24, %v372_v42 }
 0x10a   :  { %v1530_v23 = vpop.f32.mrf.mxu0  ;;  %v1546_v26 = vpop.f32.mrf.mxu1 }
 0x10b   :  { %v619_v43 = vadd.f32 %v1530_v23, %v496_v38 }
 0x10c   :  { %v602_v25 = vpop.f32.mrf.mxu0  ;;  %v725_v28 = vpop.f32.mrf.mxu1 }
 0x10d   :  { %v617_v47 = vadd.f32 %v602_v25, %v494_v41  ;;  %v742_v49 = vadd.f32 %v1546_v26, %v619_v43 }
 0x10e   :  { %v1531_v27 = vpop.f32.mrf.mxu0  ;;  %v1547_v33 = vpop.f32.mrf.mxu1 }
 0x10f   :  { %v620_v50 = vadd.f32 %v1531_v27, %v497_v46  ;;  %v740_v53 = vadd.f32 %v725_v28, %v617_v47 }
 0x110   :  { %v605_v32 = vpop.f32.mrf.mxu0  ;;  %v728_v40 = vpop.f32.mrf.mxu1 }
 0x111   :  { %v618_v54 = vadd.f32 %v605_v32, %v495_v48  ;;  %v743_v56 = vadd.f32 %v1547_v33, %v620_v50 }
 0x113   :  { %v741_v60 = vadd.f32 %v728_v40, %v618_v54 }
 0x122   :  { %v1562_v36 = vpop.f32.mrf.mxu0  ;;  %v1578_v45 = vpop.f32.mrf.mxu1 }
 0x123   :  { %v865_v55 = vadd.f32 %v1562_v36, %v742_v49 }
 0x124   :  { %v848_v44 = vpop.f32.mrf.mxu0  ;;  %v971_v52 = vpop.f32.mrf.mxu1 }
 0x125   :  { %v863_v57 = vadd.f32 %v848_v44, %v740_v53  ;;  %v988_v61 = vadd.f32 %v1578_v45, %v865_v55 }
 0x126   :  { %v1563_v51 = vpop.f32.mrf.mxu0  ;;  %v1579_v59 = vpop.f32.mrf.mxu1 }
 0x127   :  { %v866_v62 = vadd.f32 %v1563_v51, %v743_v56  ;;  %v986_v1 = vadd.f32 %v971_v52, %v863_v57 }
 0x128   :  { %v851_v58 = vpop.f32.mrf.mxu0  ;;  %v974_v4 = vpop.f32.mrf.mxu1 }
 0x129   :  { %v864_v2 = vadd.f32 %v851_v58, %v741_v60  ;;  %v989_v6 = vadd.f32 %v1579_v59, %v866_v62 }
 0x12b   :  { %v987_v10 = vadd.f32 %v974_v4, %v864_v2 }
 0x13a   :  { %v1594_v63 = vpop.f32.mrf.mxu0 }
 0x13b   :  { %v1111_v3 = vadd.f32 %v1594_v63, %v988_v61 }
 0x13c   :  { %v1094_v5 = vpop.f32.mrf.mxu0 }
 0x13d   :  { %v1122_v7 = vadd.f32 %v1371_v0, %v1111_v3  ;;  %v1109_v8 = vadd.f32 %v1094_v5, %v986_v1 }
 0x13e   :  { %v1595_v9 = vpop.f32.mrf.mxu0 }
 0x13f   :  { %v1126_v11 = vmax.f32 %v1122_v7, 0.0  ;;  %v1120_v12 = vadd.f32 %v1371_v0, %v1109_v8  ;;  %v1112_v13 = vadd.f32 %v1595_v9, %v989_v6 }
 0x140   :  { %v1097_v14 = vpop.f32.mrf.mxu0 }
 0x141   :  { %v1378_v15 = vpack.c.bf16 %v1126_v11, %v1126_v11  ;;  %v1124_v16 = vmax.f32 %v1120_v12, 0.0  ;;  %v1123_v17 = vadd.f32 %v1371_v0, %v1112_v13  ;;  %v1110_v18 = vadd.f32 %v1097_v14, %v987_v10 }
 0x143   :  { %1147 = vst.msk [vmem:[%s1940_s3 + $0x8] sm:$0xf] %vm1144_vm1, %v1378_v15  ;;  %v1376_v19 = vpack.c.bf16 %v1124_v16, %v1124_v16  ;;  %v1127_v20 = vmax.f32 %v1123_v17, 0.0  ;;  %v1121_v21 = vadd.f32 %v1371_v0, %v1110_v18 }
 0x145   :  { %1145 = vst.msk [vmem:[%s1940_s3] sm:$0xf] %vm1144_vm1, %v1376_v19  ;;  %v1379_v22 = vpack.c.bf16 %v1127_v20, %v1127_v20  ;;  %v1125_v23 = vmax.f32 %v1121_v21, 0.0 }
 0x147   :  { %1148 = vst.msk [vmem:[%s1940_s3 + $0xc] sm:$0xf] %vm1144_vm1, %v1379_v22  ;;  %v1377_v24 = vpack.c.bf16 %v1125_v23, %v1125_v23 }
 0x149   :  { %1146 = vst.msk [vmem:[%s1940_s3 + $0x4] sm:$0xf] %vm1144_vm1, %v1377_v24 }

// kernel: discriminator_forward.7
= control target key start
LH: loop header
LB: loop body
LE: loop exit
PB: predicated region body
PF: predicated region fallthrough
CT: control target
= control target key end

     0   :  { %vm33_vm0 = vcmask 519168   ;;  %s87_s0 = inlined_call_operand.vmem [shape: bf16[9,8,64], index: 0, kind: input, shape index: {}]   ;;  %s88_s1 = inlined_call_operand.vmem [shape: bf16[8,64], index: 1, kind: output, shape index: {}]  }
   0x1   :  { %v8_v0 = vld [vmem:[%s87_s0] sm:$0xf]  ;;  %v39_v1 = vld [vmem:[%s87_s0 + $0x4] sm:$0xf]  ;;  %v40_v2 = vld [vmem:[%s87_s0 + $0x8] sm:$0xf] }
   0x2   :  { %v11_v3 = vmax.bf16 %v39_v1, %v8_v0  ;;  %v41_v4 = vld [vmem:[%s87_s0 + $0xc] sm:$0xf]  ;;  %v42_v6 = vld [vmem:[%s87_s0 + $0x10] sm:$0xf]  ;;  %v43_v8 = vld [vmem:[%s87_s0 + $0x14] sm:$0xf] }
   0x3   :  { %v44_v10 = vld [vmem:[%s87_s0 + $0x18] sm:$0xf]  ;;  %v45_v12 = vld [vmem:[%s87_s0 + $0x1c] sm:$0xf]  ;;  %v46_v14 = vld [vmem:[%s87_s0 + $0x20] sm:$0xf] }
   0x4   :  { %v14_v5 = vmax.bf16 %v40_v2, %v11_v3 }
   0x6   :  { %v17_v7 = vmax.bf16 %v41_v4, %v14_v5 }
   0x8   :  { %v20_v9 = vmax.bf16 %v42_v6, %v17_v7 }
   0xa   :  { %v23_v11 = vmax.bf16 %v43_v8, %v20_v9 }
   0xc   :  { %v26_v13 = vmax.bf16 %v44_v10, %v23_v11 }
   0xe   :  { %v29_v15 = vmax.bf16 %v45_v12, %v26_v13 }
  0x10   :  { %v32_v16 = vmax.bf16 %v46_v14, %v29_v15 }
  0x12   :  { %34 = vst.msk [vmem:[%s88_s1] sm:$0xf] %vm33_vm0, %v32_v16 }

// kernel: discriminator_forward.9
= control target key start
LH: loop header
LB: loop body
LE: loop exit
PB: predicated region body
PF: predicated region fallthrough
CT: control target
= control target key end

     0   :  { %v199_v0 = vmov 0.0   ;;  %vm200_vm0 = vmmov 0   ;;  %vm45_vm1 = vcmask 261120   ;;  %vm157_vm2 = vcmask 15360   ;;  %s257_s1 = inlined_call_operand.vmem [shape: bf16[32,32], index: 1, kind: input, shape index: {}]   ;;  %s258_s0 = inlined_call_operand.vmem [shape: bf16[8,32], index: 0, kind: input, shape index: {}]   ;;  %s259_s3 = inlined_call_operand.vmem [shape: bf16[32,2], index: 3, kind: input, shape index: {}]   ;;  %s260_s2 = inlined_call_operand.vmem [shape: f32[1,32], index: 2, kind: input, shape index: {}]   ;;  %s261_s4 = inlined_call_operand.vmem [shape: f32[1,2], index: 4, kind: input, shape index: {}]   ;;  %s262_s5 = inlined_call_operand.vmem [shape: f32[8,2], index: 5, kind: output, shape index: {}]  }
   0x1   :  { %177 = vmatprep.subr.bf16.mxu0 %v199_v0  ;;  %v195_v1 = vld [vmem:[%s257_s1 + $0x8] sm:$0xff]   ;;  %181 = vmatprep.mubr.msk.bf16.mxu0 %vm200_vm0, %v199_v0  ;;  %v196_v2 = vld [vmem:[%s257_s1] sm:$0xff]  }
   0x2   :  { %185 = vmatprep.subr.bf16.mxu1 %v199_v0  ;;  %189 = vmatprep.mubr.msk.bf16.mxu1 %vm200_vm0, %v199_v0  ;;  %v21_v3 = vld [vmem:[%s258_s0] sm:$0xf]  ;;  %v197_v4 = vld [vmem:[%s259_s3 + $0x8] sm:$0xff]  }
   0x3   :  { %178 = vmatpush3.bf16.msra.mxu0 %v195_v1  ;;  %186 = vmatpush3.bf16.msra.mxu1 %v197_v4  ;;  %v198_v5 = vld [vmem:[%s259_s3] sm:$0xff]  }
   0x4   :  { %179 = vmatprep.subr.bf16.mxu0 %v199_v0  ;;  %187 = vmatprep.subr.bf16.mxu1 %v199_v0  ;;  %v163_v6 = vld [vmem:[%s260_s2] ss:$0 sm:$0xff] }
   0x5   :  { %v167_v14 = vld [vmem:[%s261_s4] ss:$0 sm:$0xff] }
   0x7   :  { %180 = vmatpush3.bf16.msra.mxu0 %v196_v2  ;;  %188 = vmatpush3.bf16.msra.mxu1 %v198_v5 }
   0xa   :  { %182 = vmatmul.mubr.msk.bf16.vlgmr.msra.gmra.mxu0 %vm45_vm1, %v21_v3 }
  0xca   :  { %v83_v7 = vpop.f32.mrf.mxu0 }
  0xcb   :  { %v84_v8 = vadd.f32 %v163_v6, %v83_v7 }
  0xcc   :  { %v183_v9 = vpop.f32.mrf.mxu0 }
  0xcd   :  { %v89_v10 = vmax.f32 %v84_v8, 0.0 }
  0xce   :  { %v86_v11 = vpop.f32.mrf.mxu0 }
  0xcf   :  { %v90_v12 = vpack.c.bf16 %v89_v10, %v89_v10 }
  0xd0   :  { %v184_v13 = vpop.f32.mrf.mxu0 }
  0xd1   :  { %190 = vmatmul.mubr.msk.bf16.vlgmr.msra.gmra.mxu1 %vm45_vm1, %v90_v12 }
 0x191   :  { %v151_v15 = vpop.f32.mrf.mxu1 }
 0x192   :  { %v152_v16 = vadd.f32 %v167_v14, %v151_v15 }
 0x193   :  { %v191_v17 = vpop.f32.mrf.mxu1 }
 0x194   :  { %158 = vst.msk [vmem:[%s262_s5] sm:$0xff] %vm157_vm2, %v152_v16 }
 0x195   :  { %v154_v18 = vpop.f32.mrf.mxu1 }
 0x197   :  { %v192_v19 = vpop.f32.mrf.mxu1 }

// kernel: discriminator_forward.8
= control target key start
LH: loop header
LB: loop body
LE: loop exit
PB: predicated region body
PF: predicated region fallthrough
CT: control target
= control target key end

     0   :  { %v1048_v0 = vmov 0.0   ;;  %vm1049_vm0 = vmmov 0   ;;  %vm59_vm1 = vcmask 523264   ;;  %vm733_vm2 = vcmask 257024   ;;  %s1274_s1 = inlined_call_operand.vmem [shape: bf16[9,64,32], index: 1, kind: input, shape index: {}]   ;;  %s1275_s0 = inlined_call_operand.vmem [shape: bf16[9,8,64], index: 0, kind: input, shape index: {}]   ;;  %s1276_s2 = inlined_call_operand.vmem [shape: f32[1,32], index: 2, kind: input, shape index: {}]   ;;  %s1277_s3 = inlined_call_operand.vmem [shape: bf16[8,32], index: 3, kind: output, shape index: {}]  }
   0x1   :  { %902 = vmatprep.subr.bf16.mxu0 %v1048_v0  ;;  %v1012_v1 = vld [vmem:[%s1274_s1 + $0x38] sm:$0xff]   ;;  %914 = vmatprep.subr.bf16.mxu1 %v1048_v0  ;;  %v1014_v3 = vld [vmem:[%s1274_s1 + $0x30] sm:$0xff]   ;;  %v1016_v5 = vld [vmem:[%s1274_s1 + $0x28] sm:$0xff]  }
   0x2   :  { %v1013_v2 = vld [vmem:[%s1274_s1 + $0x18] sm:$0xff]   ;;  %910 = vmatprep.mubr.msk.bf16.mxu0 %vm1049_vm0, %v1048_v0  ;;  %922 = vmatprep.mubr.msk.bf16.mxu1 %vm1049_vm0, %v1048_v0  ;;  %v1015_v4 = vld [vmem:[%s1274_s1 + $0x10] sm:$0xff]   ;;  %v1017_v6 = vld [vmem:[%s1274_s1 + $0x8] sm:$0xff]  }
   0x3   :  { %903 = vmatpush3.bf16.msra.mxu0 %v1012_v1  ;;  %915 = vmatpush3.bf16.msra.mxu1 %v1013_v2  ;;  %v1018_v7 = vld [vmem:[%s1274_s1 + $0x20] sm:$0xff]   ;;  %v1020_v11 = vld [vmem:[%s1274_s1 + $0x58] sm:$0xff]   ;;  %v1022_v13 = vld [vmem:[%s1274_s1 + $0x50] sm:$0xff]  }
   0x4   :  { %904 = vmatprep.subr.bf16.mxu0 %v1048_v0  ;;  %916 = vmatprep.subr.bf16.mxu1 %v1048_v0  ;;  %v1019_v8 = vld [vmem:[%s1274_s1] sm:$0xff]   ;;  %v1021_v12 = vld [vmem:[%s1274_s1 + $0x78] sm:$0xff]   ;;  %v1023_v14 = vld [vmem:[%s1274_s1 + $0x70] sm:$0xff]  }
   0x5   :  { %v739_v9 = vld [vmem:[%s1275_s0 + $0x4] sm:$0xf]  ;;  %v15_v10 = vld [vmem:[%s1275_s0] sm:$0xf]  ;;  %v1024_v15 = vld [vmem:[%s1274_s1 + $0x48] sm:$0xff]  }
   0x6   :  { %v1025_v16 = vld [vmem:[%s1274_s1 + $0x68] sm:$0xff]   ;;  %v1026_v17 = vld [vmem:[%s1274_s1 + $0x40] sm:$0xff]   ;;  %v1028_v20 = vld [vmem:[%s1274_s1 + $0x98] sm:$0xff]  }
   0x7   :  { %905 = vmatpush3.bf16.msra.mxu0 %v1014_v3  ;;  %917 = vmatpush3.bf16.msra.mxu1 %v1015_v4  ;;  %v1027_v18 = vld [vmem:[%s1274_s1 + $0x60] sm:$0xff]   ;;  %v758_v19 = vld [vmem:[%s1275_s0 + $0x8] sm:$0xf]  ;;  %v772_v21 = vld [vmem:[%s1275_s0 + $0xc] sm:$0xf] }
   0x8   :  { %906 = vmatprep.subr.bf16.mxu0 %v1048_v0  ;;  %918 = vmatprep.subr.bf16.mxu1 %v1048_v0  ;;  %v1029_v22 = vld [vmem:[%s1274_s1 + $0xb8] sm:$0xff]   ;;  %v1030_v23 = vld [vmem:[%s1274_s1 + $0x90] sm:$0xff]   ;;  %v1032_v25 = vld [vmem:[%s1274_s1 + $0x88] sm:$0xff]  }
   0x9   :  { %v1031_v24 = vld [vmem:[%s1274_s1 + $0xb0] sm:$0xff]   ;;  %v1033_v26 = vld [vmem:[%s1274_s1 + $0xa8] sm:$0xff]   ;;  %v1034_v27 = vld [vmem:[%s1274_s1 + $0x80] sm:$0xff]  }
   0xa   :  { %v1035_v28 = vld [vmem:[%s1274_s1 + $0xa0] sm:$0xff]   ;;  %v786_v29 = vld [vmem:[%s1275_s0 + $0x10] sm:$0xf]  ;;  %v1036_v30 = vld [vmem:[%s1274_s1 + $0xd8] sm:$0xff]  }
   0xb   :  { %907 = vmatpush3.bf16.msra.mxu0 %v1016_v5  ;;  %919 = vmatpush3.bf16.msra.mxu1 %v1017_v6  ;;  %v800_v31 = vld [vmem:[%s1275_s0 + $0x14] sm:$0xf]  ;;  %v1037_v32 = vld [vmem:[%s1274_s1 + $0xf8] sm:$0xff]   ;;  %v1040_v35 = vld [vmem:[%s1274_s1 + $0xc8] sm:$0xff]  }
   0xc   :  { %908 = vmatprep.subr.bf16.mxu0 %v1048_v0  ;;  %920 = vmatprep.subr.bf16.mxu1 %v1048_v0  ;;  %v1038_v33 = vld [vmem:[%s1274_s1 + $0xd0] sm:$0xff]   ;;  %v1041_v36 = vld [vmem:[%s1274_s1 + $0xe8] sm:$0xff]   ;;  %v1042_v37 = vld [vmem:[%s1274_s1 + $0xc0] sm:$0xff]  }
   0xd   :  { %v1039_v34 = vld [vmem:[%s1274_s1 + $0xf0] sm:$0xff]   ;;  %v1043_v38 = vld [vmem:[%s1274_s1 + $0xe0] sm:$0xff]   ;;  %v814_v39 = vld [vmem:[%s1275_s0 + $0x18] sm:$0xf] }
   0xe   :  { %v1044_v40 = vld [vmem:[%s1274_s1 + $0x118] sm:$0xff]   ;;  %v1045_v42 = vld [vmem:[%s1274_s1 + $0x110] sm:$0xff]   ;;  %v1046_v43 = vld [vmem:[%s1274_s1 + $0x108] sm:$0xff]  }
   0xf   :  { %909 = vmatpush3.bf16.msra.mxu0 %v1018_v7  ;;  %921 = vmatpush3.bf16.msra.mxu1 %v1019_v8  ;;  %v828_v41 = vld [vmem:[%s1275_s0 + $0x1c] sm:$0xf]  ;;  %v1047_v44 = vld [vmem:[%s1274_s1 + $0x100] sm:$0xff]  }
  0x10   :  { %926 = vmatprep.subr.bf16.mxu0 %v1048_v0  ;;  %938 = vmatprep.subr.bf16.mxu1 %v1048_v0  ;;  %v842_v45 = vld [vmem:[%s1275_s0 + $0x20] sm:$0xf] }
  0x12   :  { %911 = vmatmul.mubr.msk.bf16.vlgmr.msra.gmra.mxu0 %vm59_vm1, %v739_v9  ;;  %923 = vmatmul.mubr.msk.bf16.vlgmr.msra.gmra.mxu1 %vm59_vm1, %v15_v10 }
  0x13   :  { %927 = vmatpush3.bf16.msra.mxu0 %v1020_v11  ;;  %939 = vmatpush3.bf16.msra.mxu1 %v1021_v12 }
  0x14   :  { %928 = vmatprep.subr.bf16.mxu0 %v1048_v0  ;;  %940 = vmatprep.subr.bf16.mxu1 %v1048_v0 }
  0x15   :  { %934 = vmatprep.mubr.msk.bf16.mxu0 %vm1049_vm0, %v1048_v0  ;;  %946 = vmatprep.mubr.msk.bf16.mxu1 %vm1049_vm0, %v1048_v0 }
  0x17   :  { %929 = vmatpush3.bf16.msra.mxu0 %v1022_v13  ;;  %941 = vmatpush3.bf16.msra.mxu1 %v1023_v14 }
  0x18   :  { %930 = vmatprep.subr.bf16.mxu0 %v1048_v0  ;;  %942 = vmatprep.subr.bf16.mxu1 %v1048_v0 }
  0x1b   :  { %931 = vmatpush3.bf16.msra.mxu0 %v1024_v15  ;;  %943 = vmatpush3.bf16.msra.mxu1 %v1025_v16 }
  0x1c   :  { %932 = vmatprep.subr.bf16.mxu0 %v1048_v0  ;;  %944 = vmatprep.subr.bf16.mxu1 %v1048_v0 }
  0x1f   :  { %933 = vmatpush3.bf16.msra.mxu0 %v1026_v17  ;;  %945 = vmatpush3.bf16.msra.mxu1 %v1027_v18 }
  0x20   :  { %950 = vmatprep.subr.bf16.mxu0 %v1048_v0  ;;  %962 = vmatprep.subr.bf16.mxu1 %v1048_v0 }
  0x22   :  { %935 = vmatmul.mubr.msk.bf16.vlgmr.msra.gmra.mxu0 %vm59_vm1, %v758_v19  ;;  %947 = vmatmul.mubr.msk.bf16.vlgmr.msra.gmra.mxu1 %vm59_vm1, %v772_v21 }
  0x23   :  { %951 = vmatpush3.bf16.msra.mxu0 %v1028_v20  ;;  %963 = vmatpush3.bf16.msra.mxu1 %v1029_v22  ;;  %v856_v22 = vld [vmem:[%s1276_s2] ss:$0 sm:$0xff] }
  0x24   :  { %952 = vmatprep.subr.bf16.mxu0 %v1048_v0  ;;  %964 = vmatprep.subr.bf16.mxu1 %v1048_v0 }
  0x25   :  { %958 = vmatprep.mubr.msk.bf16.mxu0 %vm1049_vm0, %v1048_v0  ;;  %970 = vmatprep.mubr.msk.bf16.mxu1 %vm1049_vm0, %v1048_v0 }
  0x27   :  { %953 = vmatpush3.bf16.msra.mxu0 %v1030_v23  ;;  %965 = vmatpush3.bf16.msra.mxu1 %v1031_v24 }
  0x28   :  { %954 = vmatprep.subr.bf16.mxu0 %v1048_v0  ;;  %966 = vmatprep.subr.bf16.mxu1 %v1048_v0 }
  0x2b   :  { %955 = vmatpush3.bf16.msra.mxu0 %v1032_v25  ;;  %967 = vmatpush3.bf16.msra.mxu1 %v1033_v26 }
  0x2c   :  { %956 = vmatprep.subr.bf16.mxu0 %v1048_v0  ;;  %968 = vmatprep.subr.bf16.mxu1 %v1048_v0 }
  0x2f   :  { %957 = vmatpush3.bf16.msra.mxu0 %v1034_v27  ;;  %969 = vmatpush3.bf16.msra.mxu1 %v1035_v28 }
  0x30   :  { %974 = vmatprep.subr.bf16.mxu0 %v1048_v0  ;;  %986 = vmatprep.subr.bf16.mxu1 %v1048_v0 }
  0x32   :  { %959 = vmatmul.mubr.msk.bf16.vlgmr.msra.gmra.mxu0 %vm59_vm1, %v786_v29  ;;  %971 = vmatmul.mubr.msk.bf16.vlgmr.msra.gmra.mxu1 %vm59_vm1, %v800_v31 }
  0x33   :  { %975 = vmatpush3.bf16.msra.mxu0 %v1036_v30  ;;  %987 = vmatpush3.bf16.msra.mxu1 %v1037_v32 }
  0x34   :  { %976 = vmatprep.subr.bf16.mxu0 %v1048_v0  ;;  %988 = vmatprep.subr.bf16.mxu1 %v1048_v0 }
  0x35   :  { %982 = vmatprep.mubr.msk.bf16.mxu0 %vm1049_vm0, %v1048_v0  ;;  %994 = vmatprep.mubr.msk.bf16.mxu1 %vm1049_vm0, %v1048_v0 }
  0x37   :  { %977 = vmatpush3.bf16.msra.mxu0 %v1038_v33  ;;  %989 = vmatpush3.bf16.msra.mxu1 %v1039_v34 }
  0x38   :  { %978 = vmatprep.subr.bf16.mxu0 %v1048_v0  ;;  %990 = vmatprep.subr.bf16.mxu1 %v1048_v0 }
  0x3b   :  { %979 = vmatpush3.bf16.msra.mxu0 %v1040_v35  ;;  %991 = vmatpush3.bf16.msra.mxu1 %v1041_v36 }
  0x3c   :  { %980 = vmatprep.subr.bf16.mxu0 %v1048_v0  ;;  %992 = vmatprep.subr.bf16.mxu1 %v1048_v0 }
  0x3f   :  { %981 = vmatpush3.bf16.msra.mxu0 %v1042_v37  ;;  %993 = vmatpush3.bf16.msra.mxu1 %v1043_v38 }
  0x40   :  { %998 = vmatprep.subr.bf16.mxu0 %v1048_v0 }
  0x42   :  { %983 = vmatmul.mubr.msk.bf16.vlgmr.msra.gmra.mxu0 %vm59_vm1, %v814_v39  ;;  %995 = vmatmul.mubr.msk.bf16.vlgmr.msra.gmra.mxu1 %vm59_vm1, %v828_v41 }
  0x43   :  { %999 = vmatpush3.bf16.msra.mxu0 %v1044_v40  ;;  %1006 = vmatprep.mubr.msk.bf16.mxu0 %vm1049_vm0, %v1048_v0 }
  0x44   :  { %1000 = vmatprep.subr.bf16.mxu0 %v1048_v0 }
  0x47   :  { %1001 = vmatpush3.bf16.msra.mxu0 %v1045_v42 }
  0x48   :  { %1002 = vmatprep.subr.bf16.mxu0 %v1048_v0 }
  0x4b   :  { %1003 = vmatpush3.bf16.msra.mxu0 %v1046_v43 }
  0x4c   :  { %1004 = vmatprep.subr.bf16.mxu0 %v1048_v0 }
  0x4f   :  { %1005 = vmatpush3.bf16.msra.mxu0 %v1047_v44 }
  0x52   :  { %1007 = vmatmul.mubr.msk.bf16.vlgmr.msra.gmra.mxu0 %vm59_vm1, %v842_v45 }
  0xd2   :  { %v97_v46 = vpop.f32.mrf.mxu0  ;;  %v164_v47 = vpop.f32.mrf.mxu1 }
  0xd3   :  { %v165_v6 = vadd.f32 %v164_v47, %v97_v46 }
  0xd4   :  { %v912_v48 = vpop.f32.mrf.mxu0  ;;  %v924_v49 = vpop.f32.mrf.mxu1 }
  0xd6   :  { %v100_v50 = vpop.f32.mrf.mxu0  ;;  %v167_v51 = vpop.f32.mrf.mxu1 }
  0xd8   :  { %v913_v52 = vpop.f32.mrf.mxu0  ;;  %v925_v53 = vpop.f32.mrf.mxu1 }
  0xe2   :  { %v242_v54 = vpop.f32.mrf.mxu0  ;;  %v321_v55 = vpop.f32.mrf.mxu1 }
  0xe3   :  { %v248_v7 = vadd.f32 %v242_v54, %v165_v6 }
  0xe4   :  { %v936_v56 = vpop.f32.mrf.mxu0  ;;  %v948_v57 = vpop.f32.mrf.mxu1 }
  0xe5   :  { %v327_v11 = vadd.f32 %v321_v55, %v248_v7 }
  0xe6   :  { %v245_v58 = vpop.f32.mrf.mxu0  ;;  %v324_v59 = vpop.f32.mrf.mxu1 }
  0xe8   :  { %v937_v60 = vpop.f32.mrf.mxu0  ;;  %v949_v61 = vpop.f32.mrf.mxu1 }
  0xf2   :  { %v400_v62 = vpop.f32.mrf.mxu0  ;;  %v479_v63 = vpop.f32.mrf.mxu1 }
  0xf3   :  { %v406_v14 = vadd.f32 %v400_v62, %v327_v11 }
  0xf4   :  { %v960_v0 = vpop.f32.mrf.mxu0  ;;  %v972_v1 = vpop.f32.mrf.mxu1 }
  0xf5   :  { %v485_v18 = vadd.f32 %v479_v63, %v406_v14 }
  0xf6   :  { %v403_v2 = vpop.f32.mrf.mxu0  ;;  %v482_v3 = vpop.f32.mrf.mxu1 }
  0xf8   :  { %v961_v4 = vpop.f32.mrf.mxu0  ;;  %v973_v5 = vpop.f32.mrf.mxu1 }
 0x102   :  { %v558_v8 = vpop.f32.mrf.mxu0  ;;  %v637_v9 = vpop.f32.mrf.mxu1 }
 0x103   :  { %v564_v19 = vadd.f32 %v558_v8, %v485_v18 }
 0x104   :  { %v984_v10 = vpop.f32.mrf.mxu0  ;;  %v996_v12 = vpop.f32.mrf.mxu1 }
 0x105   :  { %v643_v20 = vadd.f32 %v637_v9, %v564_v19 }
 0x106   :  { %v561_v13 = vpop.f32.mrf.mxu0  ;;  %v640_v15 = vpop.f32.mrf.mxu1 }
 0x108   :  { %v985_v16 = vpop.f32.mrf.mxu0  ;;  %v997_v17 = vpop.f32.mrf.mxu1 }
 0x112   :  { %v716_v21 = vpop.f32.mrf.mxu0 }
 0x113   :  { %v722_v23 = vadd.f32 %v716_v21, %v643_v20 }
 0x114   :  { %v1008_v24 = vpop.f32.mrf.mxu0 }
 0x115   :  { %v730_v25 = vadd.f32 %v856_v22, %v722_v23 }
 0x116   :  { %v719_v26 = vpop.f32.mrf.mxu0 }
 0x117   :  { %v731_v27 = vmax.f32 %v730_v25, 0.0 }
 0x118   :  { %v1009_v28 = vpop.f32.mrf.mxu0 }
 0x119   :  { %v732_v29 = vpack.c.bf16 %v731_v27, %v731_v27 }
 0x11b   :  { %734 = vst.msk [vmem:[%s1277_s3] sm:$0xf] %vm733_vm2, %v732_v29 }

</bundles_post_ra>
